<compile_context>
chip_gen: v5e
topology: v5e:2x2
jax: 0.10.0
libtpu: 0.0.40
codegen_flags: <defaults>
</compile_context>

<pallas_src>
import functools

import numpy as np
import jax
import jax.numpy as jnp
from jax.experimental import pallas as pl
from jax.experimental.pallas import tpu as pltpu


# --------------------------------------------------------------------------
# Kernel
# --------------------------------------------------------------------------
def _pool_kernel(x_ref, p_ref, o_ref, *, inv_area, precision):
    # x_ref: (BC, H*W)    batch of flattened spatial planes (native dtype)
    # p_ref: (H*W, OH*OW) exact 0/1 window-membership matrix
    # o_ref: (BC, OH*OW)  lane-dense output slab
    acc = jnp.dot(
        x_ref[...], p_ref[...],
        precision=precision,
        preferred_element_type=jnp.float32,
    )
    o_ref[...] = (acc * inv_area).astype(o_ref.dtype)


# --------------------------------------------------------------------------
# Helpers
# --------------------------------------------------------------------------
def _normalize_output_size(output_size, H, W):
    if isinstance(output_size, int):
        oh, ow = output_size, output_size
    else:
        oh, ow = output_size[0], output_size[1]
    oh = H if oh is None else int(oh)
    ow = W if ow is None else int(ow)
    assert H % oh == 0, (
        "Only support the case that input size can be divided equally by "
        "output size, but got input {} and output {} in dim 2".format(H, oh))
    assert W % ow == 0, (
        "Only support the case that input size can be divided equally by "
        "output size, but got input {} and output {} in dim 3".format(W, ow))
    return oh, ow


_POOL_MATRIX_CACHE = {}


def _fused_pool_matrix(H, W, oh, ow, dtype):
    """P[h*W + w, o*ow + p] = 1 iff (h // kh == o) and (w // kw == p).

    Exact 0/1 entries (representable in bf16/f16/f32); the 1/(kh*kw) average
    scale is applied on the f32 accumulator inside the kernel.
    """
    key = (H, W, oh, ow, jnp.dtype(dtype).name)
    cached = _POOL_MATRIX_CACHE.get(key)
    if cached is not None:
        return cached
    kh, kw = H // oh, W // ow
    hh = np.arange(H)[:, None]
    ww = np.arange(W)[None, :]
    rows = (hh * W + ww).reshape(-1)
    cols = ((hh // kh) * ow + (ww // kw)).reshape(-1)
    p = np.zeros((H * W, oh * ow), dtype=np.float32)
    p[rows, cols] = 1.0
    p = jnp.asarray(p, dtype=dtype)
    _POOL_MATRIX_CACHE[key] = p
    return p


def _sublane_multiple(dtype):
    # f32 -> 8, bf16/f16 -> 16, int8/fp8 -> 32 (sub-32-bit packs along sublanes)
    return max(8, 32 // jnp.dtype(dtype).itemsize)


def _tpu_vmem_capacity_bytes():
    try:
        cap = int(pltpu.get_tpu_info().vmem_capacity_bytes)
        if cap > 0:
            return cap
    except Exception:
        pass
    return 64 << 20  # conservative (v7x-sized) fallback, safe on all parts


def _num_tensorcores():
    """Best-effort TensorCore-per-chip count (2 only on megacore parts)."""
    try:
        info = pltpu.get_tpu_info()
        for name in ("num_tensorcores", "tensorcores_per_chip", "num_cores",
                     "cores_per_chip"):
            v = getattr(info, name, None)
            if v:
                return int(v)
    except Exception:
        pass
    try:
        kind = jax.devices()[0].device_kind.lower()
        if "v7" in kind or "7x" in kind:
            return 2
    except Exception:
        pass
    return 1


def _choose_block_rows(NC, HW, OHW, itemsize, sub, vmem_limit, num_tc):
    """Largest BC (multiple of `sub`) whose buffers fit the VMEM budget."""
    budget = int(vmem_limit * 0.85)              # headroom for compiler scratch
    p_bytes = 2 * HW * OHW * itemsize            # P, counted double-buffered
    per_row = 2 * (HW + OHW) * itemsize          # double-buffered in + out rows
    bc = ((budget - p_bytes) // max(per_row, 1) // sub) * sub
    bc = max(sub, bc)
    if num_tc >= 2 and NC >= 2 * sub:
        # Keep >= num_tc grid steps so megacore sharding has balanced work.
        bc_cap = max(sub, ((pl.cdiv(NC, num_tc) + sub - 1) // sub) * sub)
        bc = min(bc, bc_cap)
    return bc


# --------------------------------------------------------------------------
# Wrapper
# --------------------------------------------------------------------------
def adaptive_avg_pool2d(x, output_size, *, _max_block_rows=None):
    N, C, H, W = x.shape
    oh, ow = _normalize_output_size(output_size, H, W)
    kh, kw = H // oh, W // ow
    HW, OHW = H * W, oh * ow
    NC = N * C
    itemsize = jnp.dtype(x.dtype).itemsize

    # TODO(synk): for very large OH*OW the dense-P matmul becomes MXU-bound;
    # a separable (W-pool then H-pool) path would be preferable there.
    P = _fused_pool_matrix(H, W, oh, ow, x.dtype)

    # ---- block sizing against a generation-aware VMEM limit ---------------
    sub = _sublane_multiple(x.dtype)
    vmem_cap = _tpu_vmem_capacity_bytes()
    vmem_limit = max(16 << 20, (vmem_cap * 5) // 8)   # ~62%: 40 MiB v7x, 80 MiB v5e/v6e
    num_tc = _num_tensorcores()

    bc = _choose_block_rows(NC, HW, OHW, itemsize, sub, vmem_limit, num_tc)
    if _max_block_rows is not None:               # test hook / manual override
        bc = min(bc, max(sub, (int(_max_block_rows) // sub) * sub))
    BC = NC if bc >= NC else bc                    # full dim is always legal

    grid = (pl.cdiv(NC, BC),)                      # ragged tail is write-masked
    x2 = x.reshape(NC, HW)

    # Pin MXU precision: deterministic pass count / numerics across compilers.
    if jnp.dtype(x.dtype) == jnp.dtype(jnp.float32):
        precision = jax.lax.Precision.HIGHEST
    else:
        precision = jax.lax.Precision.DEFAULT

    inv_area = 1.0 / float(kh * kw)
    flops = 2 * NC * HW * OHW
    bytes_accessed = NC * (HW + OHW) * itemsize + HW * OHW * itemsize

    def _call(single_buffer_p, prec):
        kernel = functools.partial(
            _pool_kernel, inv_area=inv_area, precision=prec)
        if single_buffer_p:
            # Constant index map -> DMA'd once; single buffer halves its VMEM.
            p_spec = pl.BlockSpec((HW, OHW), lambda i: (0, 0),
                                  pipeline_mode=pl.Buffered(1))
        else:
            p_spec = pl.BlockSpec((HW, OHW), lambda i: (0, 0))
        return pl.pallas_call(
            kernel,
            out_shape=jax.ShapeDtypeStruct((NC, OHW), x.dtype),
            grid=grid,
            in_specs=[
                pl.BlockSpec((BC, HW), lambda i: (i, 0)),
                p_spec,
            ],
            out_specs=pl.BlockSpec((BC, OHW), lambda i: (i, 0)),
            compiler_params=pltpu.CompilerParams(
                dimension_semantics=("parallel",),
                vmem_limit_bytes=int(vmem_limit)),
            cost_estimate=pl.CostEstimate(
                flops=int(flops),
                transcendentals=0,
                bytes_accessed=int(bytes_accessed)),
        )(x2, P)

    # Preferred config first; degrade gracefully if this JAX build rejects
    # pipeline_mode=Buffered(1) or the pinned precision.
    out = None
    last_err = None
    for cfg in ((True, precision), (False, precision), (False, None)):
        try:
            out = _call(*cfg)
            break
        except Exception as e:   # version-dependent feature fallback
            last_err = e
            out = None
    if out is None:
        raise last_err

    return out.reshape(N, C, oh, ow)


class AdaptiveAvgPool2d:
    """Pallas port of the QAT AdaptiveAvgPool2d forward (float path).

    # TODO(synk): activation_post_process (FakeQuantize observer), QTensor
    # scale bookkeeping, and the BERNOULLI-march divisor-shift rescale depend
    # on runtime quantization state / get_march(); only the core
    # adaptive_avg_pool2d compute is implemented here.
    """

    def __init__(self, output_size):
        assert isinstance(output_size, (int, tuple, list)), (
            "output size must be int, tuple or list, but got {}".format(
                type(output_size)))
        self.output_size = output_size

    def __call__(self, x):
        return adaptive_avg_pool2d(x, self.output_size)


if __name__ == "__main__":
    key = jax.random.PRNGKey(0)
    k1, k2 = jax.random.split(key)

    # Test 1: typical small shape (single grid step, full-dim block).
    N, C, H, W = 2, 4, 16, 16
    x = jax.random.normal(k1, (N, C, H, W), dtype=jnp.float32)
    mod = AdaptiveAvgPool2d((4, 4))
    out = mod(x)
    jax.block_until_ready(out)
    ref = x.reshape(N, C, 4, H // 4, 4, W // 4).mean(axis=(3, 5))
    assert out.shape == (N, C, 4, 4), out.shape
    assert jnp.allclose(out, ref, atol=1e-5), float(jnp.max(jnp.abs(out - ref)))

    # Test 2: ragged grid (NC=21 with an 8-row block) exercises Pallas
    # write-masking of the final partial block (no pad round-trip).
    xr = jax.random.normal(k2, (3, 7, 8, 8), dtype=jnp.float32)
    out_r = adaptive_avg_pool2d(xr, 2, _max_block_rows=8)
    jax.block_until_ready(out_r)
    ref_r = xr.reshape(3, 7, 2, 4, 2, 4).mean(axis=(3, 5))
    assert out_r.shape == (3, 7, 2, 2), out_r.shape
    assert jnp.allclose(out_r, ref_r, atol=1e-5), float(
        jnp.max(jnp.abs(out_r - ref_r)))

    print("KERNEL_OK")
</pallas_src>

<mosaic_0001>
module attributes {stable_mosaic.version = 11 : i64} {
  func.func @_pool_kernel(%arg0: i32, %arg1: memref<8x256xf32, #tpu.memory_space<vmem>>, %arg2: memref<256x16xf32, #tpu.memory_space<vmem>>, %arg3: memref<8x16xf32, #tpu.memory_space<vmem>>) attributes {dimension_semantics = [#tpu.dimension_semantics<parallel>], iteration_bounds = array<i64: 1>, scalar_prefetch = 0 : i64, scratch_operands = 0 : i64, tpu.core_type = #tpu.core_type<tc>, window_params = [{transform_indices = @transform_0, window_bounds = array<i64: 8, 256>}, {pipeline_mode = #tpu.pipeline_mode<synchronous>, transform_indices = @transform_1, window_bounds = array<i64: 256, 16>}, {transform_indices = @transform_2, window_bounds = array<i64: 8, 16>}]} {
    %c0 = arith.constant 0 : index
    %c0_0 = arith.constant 0 : index
    %0 = vector.load %arg1[%c0, %c0_0] : memref<8x256xf32, #tpu.memory_space<vmem>>, vector<8x256xf32>
    %c0_1 = arith.constant 0 : index
    %c0_2 = arith.constant 0 : index
    %1 = vector.load %arg2[%c0_1, %c0_2] : memref<256x16xf32, #tpu.memory_space<vmem>>, vector<256x16xf32>
    %cst = arith.constant dense<0.000000e+00> : vector<8x16xf32>
    %2 = tpu.matmul %0, %1, %cst {dimension_numbers = #tpu.dot_dimension_numbers<[1], [0], [0], [1], [0, 0, 1, 1], [], []>, precision = #tpu.contract_precision<fp32>} : vector<8x256xf32>, vector<256x16xf32>, vector<8x16xf32> -> vector<8x16xf32>
    %cst_3 = arith.constant 6.250000e-02 : f32
    %3 = vector.broadcast %cst_3 : f32 to vector<8x16xf32>
    %4 = arith.mulf %2, %3 : vector<8x16xf32>
    %c0_4 = arith.constant 0 : index
    %c0_5 = arith.constant 0 : index
    %5 = vector.load %arg3[%c0_4, %c0_5] : memref<8x16xf32, #tpu.memory_space<vmem>>, vector<8x16xf32>
    tpu.vector_store %arg3[%c0_4, %c0_5], %4 {strides = array<i32>} : memref<8x16xf32, #tpu.memory_space<vmem>>, vector<8x16xf32>,
    return
  }
  func.func @transform_0(%arg0: i32) -> (i32, i32) {
    %c0_i32 = arith.constant 0 : i32
    %c0_i32_0 = arith.constant 0 : i32
    return %arg0, %c0_i32 : i32, i32
  }
  func.func @transform_1(%arg0: i32) -> (i32, i32) {
    %c0_i32 = arith.constant 0 : i32
    %c0_i32_0 = arith.constant 0 : i32
    %c0_i32_1 = arith.constant 0 : i32
    return %c0_i32, %c0_i32_0 : i32, i32
  }
  func.func @transform_2(%arg0: i32) -> (i32, i32) {
    %c0_i32 = arith.constant 0 : i32
    %c0_i32_0 = arith.constant 0 : i32
    return %arg0, %c0_i32 : i32, i32
  }
}

module attributes {stable_mosaic.version = 11 : i64} {
  func.func @_pool_kernel(%arg0: i32, %arg1: memref<8x256xf32, #tpu.memory_space<vmem>>, %arg2: memref<256x16xf32, #tpu.memory_space<vmem>>, %arg3: memref<8x16xf32, #tpu.memory_space<vmem>>) attributes {dimension_semantics = [#tpu.dimension_semantics<parallel>], iteration_bounds = array<i64: 1>, scalar_prefetch = 0 : i64, scratch_operands = 0 : i64, tpu.core_type = #tpu.core_type<tc>, window_params = [{transform_indices = @transform_0, window_bounds = array<i64: 8, 256>}, {pipeline_mode = #tpu.pipeline_mode<synchronous>, transform_indices = @transform_1, window_bounds = array<i64: 256, 16>}, {transform_indices = @transform_2, window_bounds = array<i64: 8, 16>}]} {
    %c0 = arith.constant 0 : index
    %c0_0 = arith.constant 0 : index
    %0 = vector.load %arg1[%c0, %c0_0] : memref<8x256xf32, #tpu.memory_space<vmem>>, vector<8x256xf32>
    %c0_1 = arith.constant 0 : index
    %c0_2 = arith.constant 0 : index
    %1 = vector.load %arg2[%c0_1, %c0_2] : memref<256x16xf32, #tpu.memory_space<vmem>>, vector<256x16xf32>
    %cst = arith.constant dense<0.000000e+00> : vector<8x16xf32>
    %2 = tpu.matmul %0, %1, %cst {dimension_numbers = #tpu.dot_dimension_numbers<[1], [0], [0], [1], [0, 0, 1, 1], [], []>, precision = #tpu.contract_precision<fp32>} : vector<8x256xf32>, vector<256x16xf32>, vector<8x16xf32> -> vector<8x16xf32>
    %cst_3 = arith.constant 6.250000e-02 : f32
    %3 = vector.broadcast %cst_3 : f32 to vector<8x16xf32>
    %4 = arith.mulf %2, %3 : vector<8x16xf32>
    %c0_4 = arith.constant 0 : index
    %c0_5 = arith.constant 0 : index
    %5 = vector.load %arg3[%c0_4, %c0_5] : memref<8x16xf32, #tpu.memory_space<vmem>>, vector<8x16xf32>
    tpu.vector_store %arg3[%c0_4, %c0_5], %4 {strides = array<i32>} : memref<8x16xf32, #tpu.memory_space<vmem>>, vector<8x16xf32>,
    return
  }
  func.func @transform_0(%arg0: i32) -> (i32, i32) {
    %c0_i32 = arith.constant 0 : i32
    %c0_i32_0 = arith.constant 0 : i32
    return %arg0, %c0_i32 : i32, i32
  }
  func.func @transform_1(%arg0: i32) -> (i32, i32) {
    %c0_i32 = arith.constant 0 : i32
    %c0_i32_0 = arith.constant 0 : i32
    %c0_i32_1 = arith.constant 0 : i32
    return %c0_i32, %c0_i32_0 : i32, i32
  }
  func.func @transform_2(%arg0: i32) -> (i32, i32) {
    %c0_i32 = arith.constant 0 : i32
    %c0_i32_0 = arith.constant 0 : i32
    return %arg0, %c0_i32 : i32, i32
  }
}

module attributes {stable_mosaic.version = 11 : i64} {
  func.func @_pool_kernel(%arg0: i32, %arg1: memref<8x256xf32, #tpu.memory_space<vmem>>, %arg2: memref<256x16xf32, #tpu.memory_space<vmem>>, %arg3: memref<8x16xf32, #tpu.memory_space<vmem>>) attributes {dimension_semantics = [#tpu.dimension_semantics<parallel>], iteration_bounds = array<i64: 1>, scalar_prefetch = 0 : i64, scratch_operands = 0 : i64, tpu.core_type = #tpu.core_type<tc>, window_params = [{transform_indices = @transform_0, window_bounds = array<i64: 8, 256>}, {pipeline_mode = #tpu.pipeline_mode<synchronous>, transform_indices = @transform_1, window_bounds = array<i64: 256, 16>}, {transform_indices = @transform_2, window_bounds = array<i64: 8, 16>}]} {
    %c0 = arith.constant 0 : index
    %c0_0 = arith.constant 0 : index
    %0 = vector.load %arg1[%c0, %c0_0] : memref<8x256xf32, #tpu.memory_space<vmem>>, vector<8x256xf32>
    %c0_1 = arith.constant 0 : index
    %c0_2 = arith.constant 0 : index
    %1 = vector.load %arg2[%c0_1, %c0_2] : memref<256x16xf32, #tpu.memory_space<vmem>>, vector<256x16xf32>
    %cst = arith.constant dense<0.000000e+00> : vector<8x16xf32>
    %2 = tpu.matmul %0, %1, %cst {dimension_numbers = #tpu.dot_dimension_numbers<[1], [0], [0], [1], [0, 0, 1, 1], [], []>} : vector<8x256xf32>, vector<256x16xf32>, vector<8x16xf32> -> vector<8x16xf32>
    %cst_3 = arith.constant 6.250000e-02 : f32
    %3 = vector.broadcast %cst_3 : f32 to vector<8x16xf32>
    %4 = arith.mulf %2, %3 : vector<8x16xf32>
    %c0_4 = arith.constant 0 : index
    %c0_5 = arith.constant 0 : index
    %5 = vector.load %arg3[%c0_4, %c0_5] : memref<8x16xf32, #tpu.memory_space<vmem>>, vector<8x16xf32>
    tpu.vector_store %arg3[%c0_4, %c0_5], %4 {strides = array<i32>} : memref<8x16xf32, #tpu.memory_space<vmem>>, vector<8x16xf32>,
    return
  }
  func.func @transform_0(%arg0: i32) -> (i32, i32) {
    %c0_i32 = arith.constant 0 : i32
    %c0_i32_0 = arith.constant 0 : i32
    return %arg0, %c0_i32 : i32, i32
  }
  func.func @transform_1(%arg0: i32) -> (i32, i32) {
    %c0_i32 = arith.constant 0 : i32
    %c0_i32_0 = arith.constant 0 : i32
    %c0_i32_1 = arith.constant 0 : i32
    return %c0_i32, %c0_i32_0 : i32, i32
  }
  func.func @transform_2(%arg0: i32) -> (i32, i32) {
    %c0_i32 = arith.constant 0 : i32
    %c0_i32_0 = arith.constant 0 : i32
    return %arg0, %c0_i32 : i32, i32
  }
}

</mosaic_0001>

<bundles_post_ra>
// kernel: tpu_custom_call.1
= control target key start
LH: loop header
LB: loop body
LE: loop exit
PB: predicated region body
PF: predicated region fallthrough
CT: control target
= control target key end

     0   :  { %s1401_s0 = inlined_call_operand.vmem [shape: f32[8,256], index: 0, kind: input, shape index: {}]   ;;  %s1402_s1 = inlined_call_operand.vmem [shape: f32[256,16], index: 1, kind: input, shape index: {}]   ;;  %s1403_s2 = inlined_call_operand.hbm [shape: f32[8,16], index: 2, kind: output, shape index: {}]  }
   0x1   :  { %v29_v0 = vld [vmem:[%s1402_s1 + $0x78] sm:$0xff]  ;;  %v28_v1 = vld [vmem:[%s1402_s1 + $0x70] sm:$0xff]  ;;  %v27_v2 = vld [vmem:[%s1402_s1 + $0x68] sm:$0xff] }
   0x2   :  { %v799_v3 = vand.u32 4294901760, %v29_v0  ;;  %v801_v4 = vand.u32 4294901760, %v28_v1  ;;  %v803_v5 = vand.u32 4294901760, %v27_v2  ;;  %v26_v6 = vld [vmem:[%s1402_s1 + $0x60] sm:$0xff]  ;;  %v25_v7 = vld [vmem:[%s1402_s1 + $0x58] sm:$0xff]  ;;  %v24_v8 = vld [vmem:[%s1402_s1 + $0x50] sm:$0xff] }
   0x3   :  { %v814_v9 = vand.u32 4294901760, %v26_v6  ;;  %v816_v10 = vand.u32 4294901760, %v25_v7  ;;  %v818_v11 = vand.u32 4294901760, %v24_v8  ;;  %v23_v12 = vld [vmem:[%s1402_s1 + $0x48] sm:$0xff]  ;;  %v22_v13 = vld [vmem:[%s1402_s1 + $0x40] sm:$0xff]  ;;  %v21_v18 = vld [vmem:[%s1402_s1 + $0x38] sm:$0xff] }
   0x4   :  { %47 = vmatpush.msra.mxu0 %v799_v3  ;;  %v828_v14 = vsub.f32 %v29_v0, %v799_v3  ;;  %v831_v15 = vsub.f32 %v28_v1, %v801_v4  ;;  %243 = vmatpush.msra.mxu3 %v799_v3  ;;  %v835_v16 = vsub.f32 %v27_v2, %v803_v5  ;;  %v837_v17 = vand.u32 4294901760, %v23_v12  ;;  %v20_v26 = vld [vmem:[%s1402_s1 + $0x30] sm:$0xff]  ;;  %v19_v34 = vld [vmem:[%s1402_s1 + $0x28] sm:$0xff] }
   0x5   :  { %v843_v19 = vsub.f32 %v26_v6, %v814_v9  ;;  %v846_v20 = vsub.f32 %v25_v7, %v816_v10  ;;  %v849_v21 = vsub.f32 %v24_v8, %v818_v11  ;;  %v856_v25 = vand.u32 4294901760, %v22_v13 }
   0x6   :  { %49 = vmatpush.msra.mxu0 %v801_v4  ;;  %190 = vmatpush.msra.mxu2 %v828_v14  ;;  %v89_v22 = vand.u32 4294901760, %v828_v14  ;;  %v1419_v23 = vand.u32 4294901760, %v831_v15  ;;  %v1417_v24 = vand.u32 4294901760, %v835_v16  ;;  %v863_v28 = vand.u32 4294901760, %v21_v18 }
   0x7   :  { %245 = vmatpush.msra.mxu3 %v801_v4  ;;  %v1415_v27 = vand.u32 4294901760, %v843_v19  ;;  %v866_v29 = vsub.f32 %v23_v12, %v837_v17  ;;  %v1413_v33 = vand.u32 4294901760, %v846_v20 }
   0x8   :  { %51 = vmatpush.msra.mxu0 %v803_v5  ;;  %193 = vmatpush.msra.mxu2 %v831_v15  ;;  %v90_v30 = vsub.f32 %v828_v14, %v89_v22  ;;  %v96_v31 = vsub.f32 %v831_v15, %v1419_v23  ;;  %v102_v32 = vsub.f32 %v835_v16, %v1417_v24 }
   0x9   :  { %7 = vsyncpa [#allocation3], 0  ;;  %247 = vmatpush.msra.mxu3 %v803_v5  ;;  %v884_v35 = vand.u32 4294901760, %v20_v26  ;;  %v1412_v36 = vand.u32 4294901760, %v849_v21  ;;  %v108_v39 = vsub.f32 %v843_v19, %v1415_v27  ;;  %v893_v40 = vsub.f32 %v22_v13, %v856_v25  ;;  %v18_v42 = vld [vmem:[%s1402_s1 + $0x20] sm:$0xff]  ;;  %v17_v48 = vld [vmem:[%s1402_s1 + $0x18] sm:$0xff] }
   0xa   :  { %53 = vmatpush.msra.mxu0 %v814_v9  ;;  %v91_v37 = vand.u32 4294901760, %v90_v30  ;;  %196 = vmatpush.msra.mxu2 %v835_v16  ;;  %v97_v38 = vand.u32 4294901760, %v96_v31  ;;  %v896_v41 = vand.u32 4294901760, %v19_v34  ;;  %v103_v43 = vand.u32 4294901760, %v102_v32  ;;  %v16_v54 = vld [vmem:[%s1402_s1 + $0x10] sm:$0xff]  ;;  %v45_v59 = vld [vmem:[%s1402_s1 + $0xf8] sm:$0xff] }
   0xb   :  { %249 = vmatpush.msra.mxu3 %v814_v9  ;;  %v114_v44 = vsub.f32 %v846_v20, %v1413_v33  ;;  %v1410_v45 = vand.u32 4294901760, %v866_v29  ;;  %v907_v46 = vsub.f32 %v21_v18, %v863_v28  ;;  %v120_v47 = vsub.f32 %v849_v21, %v1412_v36  ;;  %v15_v61 = vld [vmem:[%s1402_s1 + $0x8] sm:$0xff]  ;;  %v14_v2 = vld [vmem:[%s1402_s1] sm:$0xff]  ;;  %v44_v6 = vld [vmem:[%s1402_s1 + $0xf0] sm:$0xff]  ;;  %s738_s23 = sshll.u32 %s1403_s2, 4  ;;  %s739_s23 = int_to_ptr.hbm [resolvable:$true] %s738_s23 }
   0xc   :  { %55 = vmatpush.msra.mxu0 %v816_v10  ;;  %92 = vmatpush.msra.mxu1 %v91_v37  ;;  %v109_v49 = vand.u32 4294901760, %v108_v39  ;;  %v918_v50 = vand.u32 4294901760, %v18_v42  ;;  %v1409_v51 = vand.u32 4294901760, %v893_v40  ;;  %v922_v52 = vsub.f32 %v20_v26, %v884_v35  ;;  %v43_v32 = vld [vmem:[%s1402_s1 + $0xe8] sm:$0xff] }
   0xd   :  { %199 = vmatpush.msra.mxu2 %v843_v19  ;;  %251 = vmatpush.msra.mxu3 %v816_v10  ;;  %v927_v53 = vsub.f32 %v19_v34, %v896_v41  ;;  %v115_v55 = vand.u32 4294901760, %v114_v44  ;;  %v126_v56 = vsub.f32 %v866_v29, %v1410_v45  ;;  %v936_v57 = vand.u32 4294901760, %v17_v48  ;;  %v42_v44 = vld [vmem:[%s1402_s1 + $0xe0] sm:$0xff] }
   0xe   :  { %57 = vmatpush.msra.mxu0 %v818_v11  ;;  %98 = vmatpush.msra.mxu1 %v97_v38  ;;  %v1408_v58 = vand.u32 4294901760, %v907_v46  ;;  %v121_v60 = vand.u32 4294901760, %v120_v47  ;;  %v132_v62 = vsub.f32 %v893_v40, %v1409_v51  ;;  %v951_v63 = vand.u32 4294901760, %v16_v54  ;;  %v38_v45 = vld [vmem:[%s1402_s1 + $0xc0] sm:$0xff] }
   0xf   :  { %202 = vmatpush.msra.mxu2 %v846_v20  ;;  %253 = vmatpush.msra.mxu3 %v818_v11  ;;  %v1406_v0 = vand.u32 4294901760, %v922_v52  ;;  %v955_v1 = vsub.f32 %v18_v42, %v918_v50  ;;  %v1405_v7 = vand.u32 4294901760, %v927_v53  ;;  %v966_v8 = vand.u32 4294901760, %v45_v59 }
  0x10   :  { %59 = vmatpush.msra.mxu0 %v837_v17  ;;  %104 = vmatpush.msra.mxu1 %v103_v43  ;;  %v127_v12 = vand.u32 4294901760, %v126_v56  ;;  %v138_v13 = vsub.f32 %v907_v46, %v1408_v58  ;;  %v972_v18 = vand.u32 4294901760, %v15_v61  ;;  %v975_v26 = vsub.f32 %v17_v48, %v936_v57 }
  0x11   :  { %205 = vmatpush.msra.mxu2 %v849_v21  ;;  %255 = vmatpush.msra.mxu3 %v837_v17  ;;  %v979_v30 = vand.u32 4294901760, %v14_v2  ;;  %v981_v31 = vand.u32 4294901760, %v44_v6  ;;  %v133_v34 = vand.u32 4294901760, %v132_v62  ;;  %v144_v37 = vsub.f32 %v922_v52, %v1406_v0 }
  0x12   :  { %61 = vmatpush.msra.mxu0 %v856_v25  ;;  %110 = vmatpush.msra.mxu1 %v109_v49  ;;  %v1404_v38 = vand.u32 4294901760, %v955_v1  ;;  %v992_v39 = vsub.f32 %v16_v54, %v951_v63  ;;  %v150_v42 = vsub.f32 %v927_v53, %v1405_v7  ;;  %v1000_v43 = vsub.f32 %v45_v59, %v966_v8  ;;  %v41_v59 = vld [vmem:[%s1402_s1 + $0xd8] sm:$0xff]  ;;  %v39_v7 = vld [vmem:[%s1402_s1 + $0xc8] sm:$0xff] }
  0x13   :  { %208 = vmatpush.msra.mxu2 %v866_v29  ;;  %257 = vmatpush.msra.mxu3 %v856_v25  ;;  %v139_v47 = vand.u32 4294901760, %v138_v13  ;;  %v1407_v48 = vand.u32 4294901760, %v975_v26  ;;  %v1008_v49 = vsub.f32 %v15_v61, %v972_v18  ;;  %v1010_v54 = vand.u32 4294901760, %v43_v32  ;;  %v40_v13 = vld [vmem:[%s1402_s1 + $0xd0] sm:$0xff] }
  0x14   :  { %63 = vmatpush.msra.mxu0 %v863_v28  ;;  %116 = vmatpush.msra.mxu1 %v115_v55  ;;  %v1015_v55 = vsub.f32 %v14_v2, %v979_v30  ;;  %v1018_v56 = vsub.f32 %v44_v6, %v981_v31  ;;  %v156_v61 = vsub.f32 %v955_v1, %v1404_v38  ;;  %v1411_v62 = vand.u32 4294901760, %v992_v39 }
  0x15   :  { %211 = vmatpush.msra.mxu2 %v893_v40  ;;  %259 = vmatpush.msra.mxu3 %v863_v28  ;;  %v151_v2 = vand.u32 4294901760, %v150_v42  ;;  %v1414_v6 = vand.u32 4294901760, %v1000_v43  ;;  %v1042_v38 = vsub.f32 %v43_v32, %v1010_v54  ;;  %v1044_v42 = vand.u32 4294901760, %v41_v59 }
  0x16   :  { %65 = vmatpush.msra.mxu0 %v884_v35  ;;  %122 = vmatpush.msra.mxu1 %v121_v60  ;;  %v145_v60 = vand.u32 4294901760, %v144_v37  ;;  %v1416_v37 = vand.u32 4294901760, %v1008_v49  ;;  %v1418_v0 = vand.u32 4294901760, %v1018_v56  ;;  %v168_v32 = vsub.f32 %v992_v39, %v1411_v62 }
  0x17   :  { %214 = vmatpush.msra.mxu2 %v907_v46  ;;  %261 = vmatpush.msra.mxu3 %v884_v35  ;;  %v1060_v51 = vand.u32 4294901760, %v40_v13  ;;  %v1421_v36 = vand.u32 4294901760, %v1042_v38  ;;  %v1078_v33 = vsub.f32 %v41_v59, %v1044_v42  ;;  %v1085_v27 = vand.u32 4294901760, %v38_v45 }
  0x18   :  { %67 = vmatpush.msra.mxu0 %v896_v41  ;;  %128 = vmatpush.msra.mxu1 %v127_v12  ;;  %v1028_v12 = vand.u32 4294901760, %v42_v44  ;;  %v174_v62 = vsub.f32 %v1008_v49, %v1416_v37  ;;  %vm729_vm0 = vcmask 130048  }
  0x19   :  { %217 = vmatpush.msra.mxu2 %v922_v52  ;;  %263 = vmatpush.msra.mxu3 %v896_v41  ;;  %v1096_v24 = vsub.f32 %v40_v13, %v1060_v51  ;;  %v443_v13 = vsub.f32 %v1042_v38, %v1421_v36  ;;  %v1423_v14 = vand.u32 4294901760, %v1078_v33 }
  0x1a   :  { %69 = vmatpush.msra.mxu0 %v918_v50  ;;  %134 = vmatpush.msra.mxu1 %v133_v34  ;;  %v162_v34 = vsub.f32 %v975_v26, %v1407_v48  ;;  %v157_v48 = vand.u32 4294901760, %v156_v61  ;;  %v1058_v58 = vsub.f32 %v42_v44, %v1028_v12  ;;  %v1070_v61 = vand.u32 4294901760, %v39_v7 }
  0x1b   :  { %220 = vmatpush.msra.mxu2 %v927_v53  ;;  %265 = vmatpush.msra.mxu3 %v918_v50 }
  0x1c   :  { %71 = vmatpush.msra.mxu0 %v936_v57  ;;  %140 = vmatpush.msra.mxu1 %v139_v47  ;;  %v1420_v47 = vand.u32 4294901760, %v1015_v55  ;;  %v163_v44 = vand.u32 4294901760, %v162_v34  ;;  %v169_v34 = vand.u32 4294901760, %v168_v32  ;;  %v1422_v37 = vand.u32 4294901760, %v1058_v58 }
  0x1d   :  { %223 = vmatpush.msra.mxu2 %v955_v1  ;;  %267 = vmatpush.msra.mxu3 %v936_v57  ;;  %v1102_v23 = vsub.f32 %v39_v7, %v1070_v61  ;;  %v175_v32 = vand.u32 4294901760, %v174_v62  ;;  %v35_v62 = vld [vmem:[%s1402_s1 + $0xa8] sm:$0xff] }
  0x1e   :  { %73 = vmatpush.msra.mxu0 %v951_v63  ;;  %146 = vmatpush.msra.mxu1 %v145_v60  ;;  %v431_v60 = vsub.f32 %v1000_v43, %v1414_v6  ;;  %v437_v6 = vsub.f32 %v1018_v56, %v1418_v0  ;;  %v180_v59 = vsub.f32 %v1015_v55, %v1420_v47 }
  0x1f   :  { %226 = vmatpush.msra.mxu2 %v975_v26  ;;  %269 = vmatpush.msra.mxu3 %v951_v63  ;;  %v1118_v47 = vsub.f32 %v38_v45, %v1085_v27  ;;  %v449_v36 = vsub.f32 %v1058_v58, %v1422_v37  ;;  %v455_v37 = vsub.f32 %v1078_v33, %v1423_v14  ;;  %v1427_v14 = vand.u32 4294901760, %v1096_v24 }
  0x20   :  { %75 = vmatpush.msra.mxu0 %v972_v18  ;;  %152 = vmatpush.msra.mxu1 %v151_v2  ;;  %v37_v2 = vld [vmem:[%s1402_s1 + $0xb8] sm:$0xff]  ;;  %v432_v0 = vand.u32 4294901760, %v431_v60  ;;  %v1424_v60 = vand.u32 4294901760, %v831_v15  ;;  %v438_v7 = vand.u32 4294901760, %v437_v6  ;;  %v1425_v6 = vand.u32 4294901760, %v835_v16 }
  0x21   :  { %229 = vmatpush.msra.mxu2 %v992_v39  ;;  %271 = vmatpush.msra.mxu3 %v972_v18  ;;  %v1143_v16 = vand.u32 4294901760, %v35_v62 }
  0x22   :  { %77 = vmatpush.msra.mxu0 %v979_v30  ;;  %158 = vmatpush.msra.mxu1 %v157_v48  ;;  %v36_v48 = vld [vmem:[%s1402_s1 + $0xb0] sm:$0xff] }
  0x23   :  { %232 = vmatpush.msra.mxu2 %v1008_v49  ;;  %273 = vmatpush.msra.mxu3 %v979_v30 }
  0x24   :  { %284 = vmatpush.msrb.mxu0 %v89_v22  ;;  %164 = vmatpush.msra.mxu1 %v163_v44  ;;  %v1112_v22 = vand.u32 4294901760, %v37_v2  ;;  %v181_v44 = vand.u32 4294901760, %v180_v59  ;;  %v444_v59 = vand.u32 4294901760, %v443_v13  ;;  %v450_v13 = vand.u32 4294901760, %v449_v36  ;;  %v12_v36 = vld [vmem:[%s1401_s0] sm:$0xff] }
  0x25   :  { %235 = vmatpush.msra.mxu2 %v1015_v55  ;;  %433 = vmatpush.msrb.mxu3 %v432_v0  ;;  %v1426_v0 = vand.u32 4294901760, %v843_v19 }
  0x26   :  { %288 = vmatpush.msrb.mxu0 %v1424_v60  ;;  %170 = vmatpush.msra.mxu1 %v169_v34  ;;  %v1128_v60 = vand.u32 4294901760, %v36_v48  ;;  %v34_v34 = vld [vmem:[%s1402_s1 + $0xa0] sm:$0xff]  ;;  %v1141_v15 = vsub.f32 %v37_v2, %v1112_v22  ;;  %v461_v2 = vsub.f32 %v1096_v24, %v1427_v14 }
  0x27   :  { %388 = vmatpush.msrb.mxu2 %v966_v8  ;;  %439 = vmatpush.msrb.mxu3 %v438_v7  ;;  %v1158_v19 = vand.u32 4294901760, %v34_v34  ;;  %v1428_v7 = vand.u32 4294901760, %v846_v20 }
  0x28   :  { %292 = vmatpush.msrb.mxu0 %v1425_v6  ;;  %176 = vmatpush.msra.mxu1 %v175_v32  ;;  %v33_v32 = vld [vmem:[%s1402_s1 + $0x98] sm:$0xff]  ;;  %v1156_v45 = vsub.f32 %v36_v48, %v1128_v60  ;;  %v456_v48 = vand.u32 4294901760, %v455_v37  ;;  %v1172_v6 = vsub.f32 %v35_v62, %v1143_v16  ;;  %v32_v37 = vld [vmem:[%s1402_s1 + $0x90] sm:$0xff]  ;;  %v462_v62 = vand.u32 4294901760, %v461_v2 }
  0x29   :  { %390 = vmatpush.msrb.mxu2 %v981_v31  ;;  %445 = vmatpush.msrb.mxu3 %v444_v59  ;;  %v1174_v20 = vand.u32 4294901760, %v33_v32  ;;  %v1188_v14 = vsub.f32 %v34_v34, %v1158_v19  ;;  %v1203_v59 = vand.u32 4294901760, %v32_v37 }
  0x2a   :  { %296 = vmatpush.msrb.mxu0 %v1426_v0  ;;  %182 = vmatpush.msra.mxu1 %v181_v44  ;;  %v1429_v0 = vand.u32 4294901760, %v1102_v23 }
  0x2b   :  { %392 = vmatpush.msrb.mxu2 %v1010_v54  ;;  %451 = vmatpush.msrb.mxu3 %v450_v13  ;;  %v1433_v13 = vand.u32 4294901760, %v1141_v15 }
  0x2c   :  { %300 = vmatpush.msrb.mxu0 %v1428_v7  ;;  %351 = vmatpush.msrb.mxu1 %v799_v3  ;;  %v467_v44 = vsub.f32 %v1102_v23, %v1429_v0  ;;  %v1430_v3 = vand.u32 4294901760, %v849_v21  ;;  %v1431_v7 = vand.u32 4294901760, %v1118_v47  ;;  %v1190_v21 = vand.u32 4294901760, %v12_v36 }
  0x2d   :  { %394 = vmatpush.msrb.mxu2 %v1028_v12  ;;  %457 = vmatpush.msrb.mxu3 %v456_v48  ;;  %v479_v34 = vsub.f32 %v1141_v15, %v1433_v13  ;;  %v1435_v48 = vand.u32 4294901760, %v1156_v45  ;;  %v1438_v13 = vand.u32 4294901760, %v922_v52  ;;  %v1440_v52 = vand.u32 4294901760, %v927_v53 }
  0x2e   :  { %304 = vmatpush.msrb.mxu0 %v1430_v3  ;;  %353 = vmatpush.msrb.mxu1 %v801_v4  ;;  %v473_v0 = vsub.f32 %v1118_v47, %v1431_v7  ;;  %v1432_v4 = vand.u32 4294901760, %v866_v29  ;;  %v468_v3 = vand.u32 4294901760, %v467_v44  ;;  %v31_v7 = vld [vmem:[%s1402_s1 + $0x88] sm:$0xff]  ;;  %v1206_v29 = vsub.f32 %v33_v32, %v1174_v20 }
  0x2f   :  { %396 = vmatpush.msrb.mxu2 %v1044_v42  ;;  %463 = vmatpush.msrb.mxu3 %v462_v62  ;;  %v1217_v2 = vsub.f32 %v12_v36, %v1190_v21  ;;  %v1219_v32 = vand.u32 4294901760, %v31_v7  ;;  %v1437_v62 = vand.u32 4294901760, %v1172_v6 }
  0x30   :  { %308 = vmatpush.msrb.mxu0 %v1432_v4  ;;  %355 = vmatpush.msrb.mxu1 %v803_v5  ;;  %v1434_v5 = vand.u32 4294901760, %v893_v40  ;;  %v474_v44 = vand.u32 4294901760, %v473_v0  ;;  %v485_v4 = vsub.f32 %v1156_v45, %v1435_v48  ;;  %v30_v40 = vld [vmem:[%s1402_s1 + $0x80] sm:$0xff]  ;;  %v480_v0 = vand.u32 4294901760, %v479_v34 }
  0x31   :  { %398 = vmatpush.msrb.mxu2 %v1060_v51  ;;  %469 = vmatpush.msrb.mxu3 %v468_v3  ;;  %v491_v36 = vsub.f32 %v1172_v6, %v1437_v62  ;;  %v1233_v48 = vsub.f32 %v32_v37, %v1203_v59  ;;  %v1439_v3 = vand.u32 4294901760, %v1188_v14  ;;  %v1246_v37 = vsub.f32 %v31_v7, %v1219_v32 }
  0x32   :  { %312 = vmatpush.msrb.mxu0 %v1434_v5  ;;  %357 = vmatpush.msrb.mxu1 %v814_v9  ;;  %v1436_v9 = vand.u32 4294901760, %v907_v46  ;;  %v502_v5 = vand.u32 4294901760, %v1206_v29  ;;  %v1238_v46 = vand.u32 4294901760, %v30_v40 }
  0x33   :  { %400 = vmatpush.msrb.mxu2 %v1070_v61  ;;  %475 = vmatpush.msrb.mxu3 %v474_v44  ;;  %v497_v34 = vsub.f32 %v1188_v14, %v1439_v3  ;;  %v492_v44 = vand.u32 4294901760, %v491_v36  ;;  %v508_v7 = vand.u32 4294901760, %v1233_v48  ;;  %v514_v62 = vand.u32 4294901760, %v1246_v37 }
  0x34   :  { %316 = vmatpush.msrb.mxu0 %v1436_v9  ;;  %359 = vmatpush.msrb.mxu1 %v816_v10  ;;  %v486_v10 = vand.u32 4294901760, %v485_v4  ;;  %v80_v9 = vand.u32 4294901760, %v1217_v2  ;;  %v503_v4 = vsub.f32 %v1206_v29, %v502_v5  ;;  %v1442_v3 = vand.u32 4294901760, %v975_v26 }
  0x35   :  { %402 = vmatpush.msrb.mxu2 %v1085_v27  ;;  %481 = vmatpush.msrb.mxu3 %v480_v0  ;;  %v498_v53 = vand.u32 4294901760, %v497_v34 }
  0x36   :  { %320 = vmatpush.msrb.mxu0 %v1438_v13  ;;  %361 = vmatpush.msrb.mxu1 %v818_v11  ;;  %v13_v11 = vld [vmem:[%s1401_s0 + $0x8] sm:$0xff]  ;;  %v1441_v13 = vand.u32 4294901760, %v955_v1  ;;  %v81_v0 = vsub.f32 %v1217_v2, %v80_v9  ;;  %v509_v1 = vsub.f32 %v1233_v48, %v508_v7  ;;  %s774_s0 = smov [#allocation2]  }
  0x37   :  { %404 = vmatpush.msrb.mxu2 %v1112_v22  ;;  %487 = vmatpush.msrb.mxu3 %v486_v10  ;;  %v1268_v36 = vand.u32 4294901760, %v13_v11  ;;  %s736_s20 = sshll.u32 %s774_s0, 4  ;;  %s737_s20 = int_to_ptr.vmem [resolvable:$true] %s736_s20 }
  0x38   :  { %324 = vmatpush.msrb.mxu0 %v1440_v52  ;;  %363 = vmatpush.msrb.mxu1 %v837_v17  ;;  %v1263_v17 = vsub.f32 %v30_v40, %v1238_v46  ;;  %v1443_v40 = vand.u32 4294901760, %v992_v39  ;;  %v82_v26 = vand.u32 4294901760, %v81_v0  ;;  %v1444_v52 = vand.u32 4294901760, %v1008_v49 }
  0x39   :  { %406 = vmatpush.msrb.mxu2 %v1128_v60  ;;  %493 = vmatpush.msrb.mxu3 %v492_v44  ;;  %v1286_v34 = vsub.f32 %v13_v11, %v1268_v36  ;;  %v1445_v39 = vand.u32 4294901760, %v1015_v55 }
  0x3a   :  { %328 = vmatpush.msrb.mxu0 %v1441_v13  ;;  %365 = vmatpush.msrb.mxu1 %v856_v25  ;;  %v504_v25 = vand.u32 4294901760, %v503_v4  ;;  %v520_v10 = vand.u32 4294901760, %v1263_v17 }
  0x3b   :  { %408 = vmatpush.msrb.mxu2 %v1143_v16  ;;  %499 = vmatpush.msrb.mxu3 %v498_v53  ;;  %v421_v11 = vand.u32 4294901760, %v1286_v34 }
  0x3c   :  { %332 = vmatpush.msrb.mxu0 %v1442_v3  ;;  %367 = vmatpush.msrb.mxu1 %v863_v28  ;;  %v515_v28 = vsub.f32 %v1246_v37, %v514_v62  ;;  %v521_v44 = vsub.f32 %v1263_v17, %v520_v10 }
  0x3d   :  { %410 = vmatpush.msrb.mxu2 %v1158_v19  ;;  %505 = vmatpush.msrb.mxu3 %v504_v25 }
  0x3e   :  { %336 = vmatpush.msrb.mxu0 %v1443_v40  ;;  %369 = vmatpush.msrb.mxu1 %v884_v35  ;;  %v510_v35 = vand.u32 4294901760, %v509_v1  ;;  %v516_v49 = vand.u32 4294901760, %v515_v28 }
  0x3f   :  { %412 = vmatpush.msrb.mxu2 %v1174_v20  ;;  %83 = vmatmul.f32.vlgmr.msra.gmra.mxu0 %v82_v26 }
  0x40   :  { %340 = vmatpush.msrb.mxu0 %v1444_v52  ;;  %371 = vmatpush.msrb.mxu1 %v896_v41  ;;  %v522_v41 = vand.u32 4294901760, %v521_v44 }
  0x41   :  { %414 = vmatpush.msrb.mxu2 %v1203_v59  ;;  %511 = vmatpush.msrb.mxu3 %v510_v35 }
  0x42   :  { %344 = vmatpush.msrb.mxu0 %v1445_v39  ;;  %373 = vmatpush.msrb.mxu1 %v918_v50  ;;  %v422_v50 = vsub.f32 %v1286_v34, %v421_v11 }
  0x43   :  { %416 = vmatpush.msrb.mxu2 %v1219_v32  ;;  %517 = vmatpush.msrb.mxu3 %v516_v49 }
  0x44   :  { %531 = vmatpush.msra.mxu0 %v1000_v43  ;;  %375 = vmatpush.msrb.mxu1 %v936_v57  ;;  %v1446_v57 = vand.u32 4294901760, %v1000_v43  ;;  %v423_v55 = vand.u32 4294901760, %v422_v50  ;;  %v1448_v43 = vand.u32 4294901760, %v1042_v38 }
  0x45   :  { %238 = vmatmul.f32.vlgmr.msra.gmra.mxu2 %v1217_v2  ;;  %277 = vmatmul.f32.vlgmr.msra.gmra.mxu3 %v80_v9 }
  0x46   :  { %534 = vmatpush.msra.mxu0 %v1018_v56  ;;  %377 = vmatpush.msrb.mxu1 %v951_v63  ;;  %v1447_v63 = vand.u32 4294901760, %v1018_v56 }
  0x47   :  { %418 = vmatpush.msrb.mxu2 %v1238_v46  ;;  %523 = vmatpush.msrb.mxu3 %v522_v41 }
  0x48   :  { %537 = vmatpush.msra.mxu0 %v1042_v38  ;;  %379 = vmatpush.msrb.mxu1 %v972_v18  ;;  %v1449_v18 = vand.u32 4294901760, %v1058_v58 }
  0x49   :  { %625 = vmatpush.msra.mxu2 %v1446_v57  ;;  %184 = vmatmul.f32.vlgmr.msra.gmra.mxu1 %v1190_v21 }
  0x4a   :  { %540 = vmatpush.msra.mxu0 %v1058_v58  ;;  %692 = vmatpush.msra.mxu3 %v966_v8  ;;  %v1451_v58 = vand.u32 4294901760, %v1096_v24 }
  0x4b   :  { %629 = vmatpush.msra.mxu2 %v1447_v63  ;;  %381 = vmatpush.msrb.mxu1 %v979_v30  ;;  %v1453_v30 = vand.u32 4294901760, %v1118_v47 }
  0x4c   :  { %543 = vmatpush.msra.mxu0 %v1078_v33  ;;  %694 = vmatpush.msra.mxu3 %v981_v31 }
  0x4d   :  { %584 = vmatpush.msra.mxu1 %v966_v8  ;;  %633 = vmatpush.msra.mxu2 %v1448_v43  ;;  %v1450_v8 = vand.u32 4294901760, %v1078_v33  ;;  %v1452_v33 = vand.u32 4294901760, %v1102_v23 }
  0x4e   :  { %424 = vmatmul.f32.vlgmr.msrb.gmra.mxu2 %v423_v55  ;;  %546 = vmatpush.msra.mxu0 %v1096_v24  ;;  %v1454_v24 = vand.u32 4294901760, %v1141_v15 }
  0x4f   :  { %586 = vmatpush.msra.mxu1 %v981_v31  ;;  %637 = vmatpush.msra.mxu2 %v1449_v18 }
  0x50   :  { %696 = vmatpush.msra.mxu3 %v1010_v54  ;;  %346 = vmatmul.f32.vlgmr.msrb.gmra.mxu0 %v1190_v21 }
  0x51   :  { %525 = vmatmul.f32.vlgmr.msrb.gmra.mxu3 %v1268_v36  ;;  %549 = vmatpush.msra.mxu0 %v1102_v23  ;;  %v1455_v23 = vand.u32 4294901760, %v1156_v45 }
  0x52   :  { %588 = vmatpush.msra.mxu1 %v1010_v54  ;;  %641 = vmatpush.msra.mxu2 %v1450_v8 }
  0x53   :  { %698 = vmatpush.msra.mxu3 %v1028_v12  ;;  %383 = vmatmul.f32.vlgmr.msrb.gmra.mxu1 %v1190_v21 }
  0x54   :  { %552 = vmatpush.msra.mxu0 %v1118_v47  ;;  %590 = vmatpush.msra.mxu1 %v1028_v12 }
  0x55   :  { %645 = vmatpush.msra.mxu2 %v1451_v58  ;;  %700 = vmatpush.msra.mxu3 %v1044_v42 }
  0x56   :  { %555 = vmatpush.msra.mxu0 %v1141_v15  ;;  %592 = vmatpush.msra.mxu1 %v1044_v42 }
  0x57   :  { %649 = vmatpush.msra.mxu2 %v1452_v33  ;;  %702 = vmatpush.msra.mxu3 %v1060_v51 }
  0x58   :  { %558 = vmatpush.msra.mxu0 %v1156_v45  ;;  %594 = vmatpush.msra.mxu1 %v1060_v51  ;;  %v1456_v51 = vand.u32 4294901760, %v1172_v6 }
  0x59   :  { %653 = vmatpush.msra.mxu2 %v1453_v30  ;;  %704 = vmatpush.msra.mxu3 %v1070_v61 }
  0x5a   :  { %561 = vmatpush.msra.mxu0 %v1172_v6  ;;  %596 = vmatpush.msra.mxu1 %v1070_v61 }
  0x5b   :  { %657 = vmatpush.msra.mxu2 %v1454_v24  ;;  %706 = vmatpush.msra.mxu3 %v1085_v27 }
  0x5c   :  { %564 = vmatpush.msra.mxu0 %v1188_v14  ;;  %598 = vmatpush.msra.mxu1 %v1085_v27  ;;  %v1457_v27 = vand.u32 4294901760, %v1188_v14 }
  0x5d   :  { %661 = vmatpush.msra.mxu2 %v1455_v23  ;;  %708 = vmatpush.msra.mxu3 %v1112_v22 }
  0x5e   :  { %567 = vmatpush.msra.mxu0 %v1206_v29  ;;  %600 = vmatpush.msra.mxu1 %v1112_v22 }
  0x5f   :  { %665 = vmatpush.msra.mxu2 %v1456_v51  ;;  %710 = vmatpush.msra.mxu3 %v1128_v60 }
  0x60   :  { %570 = vmatpush.msra.mxu0 %v1233_v48  ;;  %602 = vmatpush.msra.mxu1 %v1128_v60 }
  0x61   :  { %669 = vmatpush.msra.mxu2 %v1457_v27  ;;  %712 = vmatpush.msra.mxu3 %v1143_v16 }
  0x62   :  { %573 = vmatpush.msra.mxu0 %v1246_v37  ;;  %604 = vmatpush.msra.mxu1 %v1143_v16 }
  0x63   :  { %673 = vmatpush.msra.mxu2 %v502_v5  ;;  %714 = vmatpush.msra.mxu3 %v1158_v19 }
  0x64   :  { %576 = vmatpush.msra.mxu0 %v1263_v17  ;;  %606 = vmatpush.msra.mxu1 %v1158_v19 }
  0x65   :  { %677 = vmatpush.msra.mxu2 %v508_v7  ;;  %716 = vmatpush.msra.mxu3 %v1174_v20 }
  0x66   :  { %579 = vmatmul.f32.vlgmr.msra.gmra.mxu0 %v1286_v34  ;;  %608 = vmatpush.msra.mxu1 %v1174_v20 }
  0x67   :  { %681 = vmatpush.msra.mxu2 %v514_v62  ;;  %718 = vmatpush.msra.mxu3 %v1203_v59 }
  0x68   :  { %610 = vmatpush.msra.mxu1 %v1203_v59 }
  0x69   :  { %685 = vmatpush.msra.mxu2 %v520_v10  ;;  %720 = vmatpush.msra.mxu3 %v1219_v32 }
  0x6a   :  { %687 = vmatmul.f32.vlgmr.msra.gmra.mxu2 %v1268_v36  ;;  %612 = vmatpush.msra.mxu1 %v1219_v32 }
  0x6b   :  { %722 = vmatpush.msra.mxu3 %v1238_v46 }
  0x6c   :  { %724 = vmatmul.f32.vlgmr.msra.gmra.mxu3 %v1268_v36  ;;  %614 = vmatpush.msra.mxu1 %v1238_v46 }
  0x6d   :  { %618 = vmatmul.f32.vlgmr.msra.gmra.mxu1 %v421_v11 }
  0xbc   :  { %v84_v38 = vpop.f32.mrf.mxu0 }
  0xc6   :  { %v185_v31 = vpop.f32.mrf.mxu1 }
  0xc7   :  { %v186_v54 = vadd.f32 %v185_v31, %v84_v38 }
  0xc8   :  { %v239_v56 = vpop.f32.mrf.mxu2  ;;  %v278_v42 = vpop.f32.mrf.mxu3 }
  0xc9   :  { %v240_v12 = vadd.f32 %v239_v56, %v186_v54 }
  0xcb   :  { %v279_v47 = vadd.f32 %v278_v42, %v240_v12 }
  0xcd   :  { %v347_v61 = vpop.f32.mrf.mxu0 }
  0xce   :  { %v348_v22 = vadd.f32 %v347_v61, %v279_v47 }
  0xd0   :  { %v384_v15 = vpop.f32.mrf.mxu1 }
  0xd1   :  { %v385_v60 = vadd.f32 %v384_v15, %v348_v22  ;;  %v425_v45 = vpop.f32.mrf.mxu2 }
  0xd3   :  { %v426_v16 = vadd.f32 %v425_v45, %v385_v60 }
  0xd4   :  { %v526_v6 = vpop.f32.mrf.mxu3 }
  0xd5   :  { %v527_v14 = vadd.f32 %v526_v6, %v426_v16 }
  0xe3   :  { %v580_v19 = vpop.f32.mrf.mxu0 }
  0xe4   :  { %v581_v20 = vadd.f32 %v580_v19, %v527_v14 }
  0xea   :  { %v619_v59 = vpop.f32.mrf.mxu1 }
  0xeb   :  { %v620_v21 = vadd.f32 %v619_v59, %v581_v20 }
  0xed   :  { %v688_v2 = vpop.f32.mrf.mxu2 }
  0xee   :  { %v689_v29 = vadd.f32 %v688_v2, %v620_v21 }
  0xef   :  { %v725_v32 = vpop.f32.mrf.mxu3 }
  0xf0   :  { %v726_v5 = vadd.f32 %v725_v32, %v689_v29 }
  0xf2   :  { %v728_v48 = vmul.f32 0.0625, %v726_v5 }
  0xf4   :  { %730 = vst.msk [vmem:[#allocation2] sm:$0xff] %vm729_vm0, %v728_v48 }
  0xf5   :  { %741 = dma.vmem_to_hbm [thread:$0]  %s737_s20, 128, %s739_s23, [#allocation3]  }
  0xf6   :  { %772 = dma.done.wait [#allocation3], 128  }
  0xf7   :  { %773 = vsyncadd [#allocation3], 4294967168 }
  0xf8   :  { %746 = vsyncpa [#allocation3], 1 }

// kernel: tpu_custom_call.1
= control target key start
LH: loop header
LB: loop body
LE: loop exit
PB: predicated region body
PF: predicated region fallthrough
CT: control target
= control target key end

     0   :  { %s1401_s0 = inlined_call_operand.vmem [shape: f32[8,256], index: 0, kind: input, shape index: {}]   ;;  %s1402_s1 = inlined_call_operand.vmem [shape: f32[256,16], index: 1, kind: input, shape index: {}]   ;;  %s1403_s2 = inlined_call_operand.hbm [shape: f32[8,16], index: 2, kind: output, shape index: {}]  }
   0x1   :  { %v29_v0 = vld [vmem:[%s1402_s1 + $0x78] sm:$0xff]  ;;  %v28_v1 = vld [vmem:[%s1402_s1 + $0x70] sm:$0xff]  ;;  %v27_v2 = vld [vmem:[%s1402_s1 + $0x68] sm:$0xff] }
   0x2   :  { %v799_v3 = vand.u32 4294901760, %v29_v0  ;;  %v801_v4 = vand.u32 4294901760, %v28_v1  ;;  %v803_v5 = vand.u32 4294901760, %v27_v2  ;;  %v26_v6 = vld [vmem:[%s1402_s1 + $0x60] sm:$0xff]  ;;  %v25_v7 = vld [vmem:[%s1402_s1 + $0x58] sm:$0xff]  ;;  %v24_v8 = vld [vmem:[%s1402_s1 + $0x50] sm:$0xff] }
   0x3   :  { %v814_v9 = vand.u32 4294901760, %v26_v6  ;;  %v816_v10 = vand.u32 4294901760, %v25_v7  ;;  %v818_v11 = vand.u32 4294901760, %v24_v8  ;;  %v23_v12 = vld [vmem:[%s1402_s1 + $0x48] sm:$0xff]  ;;  %v22_v13 = vld [vmem:[%s1402_s1 + $0x40] sm:$0xff]  ;;  %v21_v18 = vld [vmem:[%s1402_s1 + $0x38] sm:$0xff] }
   0x4   :  { %47 = vmatpush.msra.mxu0 %v799_v3  ;;  %v828_v14 = vsub.f32 %v29_v0, %v799_v3  ;;  %v831_v15 = vsub.f32 %v28_v1, %v801_v4  ;;  %243 = vmatpush.msra.mxu3 %v799_v3  ;;  %v835_v16 = vsub.f32 %v27_v2, %v803_v5  ;;  %v837_v17 = vand.u32 4294901760, %v23_v12  ;;  %v20_v26 = vld [vmem:[%s1402_s1 + $0x30] sm:$0xff]  ;;  %v19_v34 = vld [vmem:[%s1402_s1 + $0x28] sm:$0xff] }
   0x5   :  { %v843_v19 = vsub.f32 %v26_v6, %v814_v9  ;;  %v846_v20 = vsub.f32 %v25_v7, %v816_v10  ;;  %v849_v21 = vsub.f32 %v24_v8, %v818_v11  ;;  %v856_v25 = vand.u32 4294901760, %v22_v13 }
   0x6   :  { %49 = vmatpush.msra.mxu0 %v801_v4  ;;  %190 = vmatpush.msra.mxu2 %v828_v14  ;;  %v89_v22 = vand.u32 4294901760, %v828_v14  ;;  %v1419_v23 = vand.u32 4294901760, %v831_v15  ;;  %v1417_v24 = vand.u32 4294901760, %v835_v16  ;;  %v863_v28 = vand.u32 4294901760, %v21_v18 }
   0x7   :  { %245 = vmatpush.msra.mxu3 %v801_v4  ;;  %v1415_v27 = vand.u32 4294901760, %v843_v19  ;;  %v866_v29 = vsub.f32 %v23_v12, %v837_v17  ;;  %v1413_v33 = vand.u32 4294901760, %v846_v20 }
   0x8   :  { %51 = vmatpush.msra.mxu0 %v803_v5  ;;  %193 = vmatpush.msra.mxu2 %v831_v15  ;;  %v90_v30 = vsub.f32 %v828_v14, %v89_v22  ;;  %v96_v31 = vsub.f32 %v831_v15, %v1419_v23  ;;  %v102_v32 = vsub.f32 %v835_v16, %v1417_v24 }
   0x9   :  { %7 = vsyncpa [#allocation3], 0  ;;  %247 = vmatpush.msra.mxu3 %v803_v5  ;;  %v884_v35 = vand.u32 4294901760, %v20_v26  ;;  %v1412_v36 = vand.u32 4294901760, %v849_v21  ;;  %v108_v39 = vsub.f32 %v843_v19, %v1415_v27  ;;  %v893_v40 = vsub.f32 %v22_v13, %v856_v25  ;;  %v18_v42 = vld [vmem:[%s1402_s1 + $0x20] sm:$0xff]  ;;  %v17_v48 = vld [vmem:[%s1402_s1 + $0x18] sm:$0xff] }
   0xa   :  { %53 = vmatpush.msra.mxu0 %v814_v9  ;;  %v91_v37 = vand.u32 4294901760, %v90_v30  ;;  %196 = vmatpush.msra.mxu2 %v835_v16  ;;  %v97_v38 = vand.u32 4294901760, %v96_v31  ;;  %v896_v41 = vand.u32 4294901760, %v19_v34  ;;  %v103_v43 = vand.u32 4294901760, %v102_v32  ;;  %v16_v54 = vld [vmem:[%s1402_s1 + $0x10] sm:$0xff]  ;;  %v45_v59 = vld [vmem:[%s1402_s1 + $0xf8] sm:$0xff] }
   0xb   :  { %249 = vmatpush.msra.mxu3 %v814_v9  ;;  %v114_v44 = vsub.f32 %v846_v20, %v1413_v33  ;;  %v1410_v45 = vand.u32 4294901760, %v866_v29  ;;  %v907_v46 = vsub.f32 %v21_v18, %v863_v28  ;;  %v120_v47 = vsub.f32 %v849_v21, %v1412_v36  ;;  %v15_v61 = vld [vmem:[%s1402_s1 + $0x8] sm:$0xff]  ;;  %v14_v2 = vld [vmem:[%s1402_s1] sm:$0xff]  ;;  %v44_v6 = vld [vmem:[%s1402_s1 + $0xf0] sm:$0xff]  ;;  %s738_s23 = sshll.u32 %s1403_s2, 4  ;;  %s739_s23 = int_to_ptr.hbm [resolvable:$true] %s738_s23 }
   0xc   :  { %55 = vmatpush.msra.mxu0 %v816_v10  ;;  %92 = vmatpush.msra.mxu1 %v91_v37  ;;  %v109_v49 = vand.u32 4294901760, %v108_v39  ;;  %v918_v50 = vand.u32 4294901760, %v18_v42  ;;  %v1409_v51 = vand.u32 4294901760, %v893_v40  ;;  %v922_v52 = vsub.f32 %v20_v26, %v884_v35  ;;  %v43_v32 = vld [vmem:[%s1402_s1 + $0xe8] sm:$0xff] }
   0xd   :  { %199 = vmatpush.msra.mxu2 %v843_v19  ;;  %251 = vmatpush.msra.mxu3 %v816_v10  ;;  %v927_v53 = vsub.f32 %v19_v34, %v896_v41  ;;  %v115_v55 = vand.u32 4294901760, %v114_v44  ;;  %v126_v56 = vsub.f32 %v866_v29, %v1410_v45  ;;  %v936_v57 = vand.u32 4294901760, %v17_v48  ;;  %v42_v44 = vld [vmem:[%s1402_s1 + $0xe0] sm:$0xff] }
   0xe   :  { %57 = vmatpush.msra.mxu0 %v818_v11  ;;  %98 = vmatpush.msra.mxu1 %v97_v38  ;;  %v1408_v58 = vand.u32 4294901760, %v907_v46  ;;  %v121_v60 = vand.u32 4294901760, %v120_v47  ;;  %v132_v62 = vsub.f32 %v893_v40, %v1409_v51  ;;  %v951_v63 = vand.u32 4294901760, %v16_v54  ;;  %v38_v45 = vld [vmem:[%s1402_s1 + $0xc0] sm:$0xff] }
   0xf   :  { %202 = vmatpush.msra.mxu2 %v846_v20  ;;  %253 = vmatpush.msra.mxu3 %v818_v11  ;;  %v1406_v0 = vand.u32 4294901760, %v922_v52  ;;  %v955_v1 = vsub.f32 %v18_v42, %v918_v50  ;;  %v1405_v7 = vand.u32 4294901760, %v927_v53  ;;  %v966_v8 = vand.u32 4294901760, %v45_v59 }
  0x10   :  { %59 = vmatpush.msra.mxu0 %v837_v17  ;;  %104 = vmatpush.msra.mxu1 %v103_v43  ;;  %v127_v12 = vand.u32 4294901760, %v126_v56  ;;  %v138_v13 = vsub.f32 %v907_v46, %v1408_v58  ;;  %v972_v18 = vand.u32 4294901760, %v15_v61  ;;  %v975_v26 = vsub.f32 %v17_v48, %v936_v57 }
  0x11   :  { %205 = vmatpush.msra.mxu2 %v849_v21  ;;  %255 = vmatpush.msra.mxu3 %v837_v17  ;;  %v979_v30 = vand.u32 4294901760, %v14_v2  ;;  %v981_v31 = vand.u32 4294901760, %v44_v6  ;;  %v133_v34 = vand.u32 4294901760, %v132_v62  ;;  %v144_v37 = vsub.f32 %v922_v52, %v1406_v0 }
  0x12   :  { %61 = vmatpush.msra.mxu0 %v856_v25  ;;  %110 = vmatpush.msra.mxu1 %v109_v49  ;;  %v1404_v38 = vand.u32 4294901760, %v955_v1  ;;  %v992_v39 = vsub.f32 %v16_v54, %v951_v63  ;;  %v150_v42 = vsub.f32 %v927_v53, %v1405_v7  ;;  %v1000_v43 = vsub.f32 %v45_v59, %v966_v8  ;;  %v41_v59 = vld [vmem:[%s1402_s1 + $0xd8] sm:$0xff]  ;;  %v39_v7 = vld [vmem:[%s1402_s1 + $0xc8] sm:$0xff] }
  0x13   :  { %208 = vmatpush.msra.mxu2 %v866_v29  ;;  %257 = vmatpush.msra.mxu3 %v856_v25  ;;  %v139_v47 = vand.u32 4294901760, %v138_v13  ;;  %v1407_v48 = vand.u32 4294901760, %v975_v26  ;;  %v1008_v49 = vsub.f32 %v15_v61, %v972_v18  ;;  %v1010_v54 = vand.u32 4294901760, %v43_v32  ;;  %v40_v13 = vld [vmem:[%s1402_s1 + $0xd0] sm:$0xff] }
  0x14   :  { %63 = vmatpush.msra.mxu0 %v863_v28  ;;  %116 = vmatpush.msra.mxu1 %v115_v55  ;;  %v1015_v55 = vsub.f32 %v14_v2, %v979_v30  ;;  %v1018_v56 = vsub.f32 %v44_v6, %v981_v31  ;;  %v156_v61 = vsub.f32 %v955_v1, %v1404_v38  ;;  %v1411_v62 = vand.u32 4294901760, %v992_v39 }
  0x15   :  { %211 = vmatpush.msra.mxu2 %v893_v40  ;;  %259 = vmatpush.msra.mxu3 %v863_v28  ;;  %v151_v2 = vand.u32 4294901760, %v150_v42  ;;  %v1414_v6 = vand.u32 4294901760, %v1000_v43  ;;  %v1042_v38 = vsub.f32 %v43_v32, %v1010_v54  ;;  %v1044_v42 = vand.u32 4294901760, %v41_v59 }
  0x16   :  { %65 = vmatpush.msra.mxu0 %v884_v35  ;;  %122 = vmatpush.msra.mxu1 %v121_v60  ;;  %v145_v60 = vand.u32 4294901760, %v144_v37  ;;  %v1416_v37 = vand.u32 4294901760, %v1008_v49  ;;  %v1418_v0 = vand.u32 4294901760, %v1018_v56  ;;  %v168_v32 = vsub.f32 %v992_v39, %v1411_v62 }
  0x17   :  { %214 = vmatpush.msra.mxu2 %v907_v46  ;;  %261 = vmatpush.msra.mxu3 %v884_v35  ;;  %v1060_v51 = vand.u32 4294901760, %v40_v13  ;;  %v1421_v36 = vand.u32 4294901760, %v1042_v38  ;;  %v1078_v33 = vsub.f32 %v41_v59, %v1044_v42  ;;  %v1085_v27 = vand.u32 4294901760, %v38_v45 }
  0x18   :  { %67 = vmatpush.msra.mxu0 %v896_v41  ;;  %128 = vmatpush.msra.mxu1 %v127_v12  ;;  %v1028_v12 = vand.u32 4294901760, %v42_v44  ;;  %v174_v62 = vsub.f32 %v1008_v49, %v1416_v37  ;;  %vm729_vm0 = vcmask 130048  }
  0x19   :  { %217 = vmatpush.msra.mxu2 %v922_v52  ;;  %263 = vmatpush.msra.mxu3 %v896_v41  ;;  %v1096_v24 = vsub.f32 %v40_v13, %v1060_v51  ;;  %v443_v13 = vsub.f32 %v1042_v38, %v1421_v36  ;;  %v1423_v14 = vand.u32 4294901760, %v1078_v33 }
  0x1a   :  { %69 = vmatpush.msra.mxu0 %v918_v50  ;;  %134 = vmatpush.msra.mxu1 %v133_v34  ;;  %v162_v34 = vsub.f32 %v975_v26, %v1407_v48  ;;  %v157_v48 = vand.u32 4294901760, %v156_v61  ;;  %v1058_v58 = vsub.f32 %v42_v44, %v1028_v12  ;;  %v1070_v61 = vand.u32 4294901760, %v39_v7 }
  0x1b   :  { %220 = vmatpush.msra.mxu2 %v927_v53  ;;  %265 = vmatpush.msra.mxu3 %v918_v50 }
  0x1c   :  { %71 = vmatpush.msra.mxu0 %v936_v57  ;;  %140 = vmatpush.msra.mxu1 %v139_v47  ;;  %v1420_v47 = vand.u32 4294901760, %v1015_v55  ;;  %v163_v44 = vand.u32 4294901760, %v162_v34  ;;  %v169_v34 = vand.u32 4294901760, %v168_v32  ;;  %v1422_v37 = vand.u32 4294901760, %v1058_v58 }
  0x1d   :  { %223 = vmatpush.msra.mxu2 %v955_v1  ;;  %267 = vmatpush.msra.mxu3 %v936_v57  ;;  %v1102_v23 = vsub.f32 %v39_v7, %v1070_v61  ;;  %v175_v32 = vand.u32 4294901760, %v174_v62  ;;  %v35_v62 = vld [vmem:[%s1402_s1 + $0xa8] sm:$0xff] }
  0x1e   :  { %73 = vmatpush.msra.mxu0 %v951_v63  ;;  %146 = vmatpush.msra.mxu1 %v145_v60  ;;  %v431_v60 = vsub.f32 %v1000_v43, %v1414_v6  ;;  %v437_v6 = vsub.f32 %v1018_v56, %v1418_v0  ;;  %v180_v59 = vsub.f32 %v1015_v55, %v1420_v47 }
  0x1f   :  { %226 = vmatpush.msra.mxu2 %v975_v26  ;;  %269 = vmatpush.msra.mxu3 %v951_v63  ;;  %v1118_v47 = vsub.f32 %v38_v45, %v1085_v27  ;;  %v449_v36 = vsub.f32 %v1058_v58, %v1422_v37  ;;  %v455_v37 = vsub.f32 %v1078_v33, %v1423_v14  ;;  %v1427_v14 = vand.u32 4294901760, %v1096_v24 }
  0x20   :  { %75 = vmatpush.msra.mxu0 %v972_v18  ;;  %152 = vmatpush.msra.mxu1 %v151_v2  ;;  %v37_v2 = vld [vmem:[%s1402_s1 + $0xb8] sm:$0xff]  ;;  %v432_v0 = vand.u32 4294901760, %v431_v60  ;;  %v1424_v60 = vand.u32 4294901760, %v831_v15  ;;  %v438_v7 = vand.u32 4294901760, %v437_v6  ;;  %v1425_v6 = vand.u32 4294901760, %v835_v16 }
  0x21   :  { %229 = vmatpush.msra.mxu2 %v992_v39  ;;  %271 = vmatpush.msra.mxu3 %v972_v18  ;;  %v1143_v16 = vand.u32 4294901760, %v35_v62 }
  0x22   :  { %77 = vmatpush.msra.mxu0 %v979_v30  ;;  %158 = vmatpush.msra.mxu1 %v157_v48  ;;  %v36_v48 = vld [vmem:[%s1402_s1 + $0xb0] sm:$0xff] }
  0x23   :  { %232 = vmatpush.msra.mxu2 %v1008_v49  ;;  %273 = vmatpush.msra.mxu3 %v979_v30 }
  0x24   :  { %284 = vmatpush.msrb.mxu0 %v89_v22  ;;  %164 = vmatpush.msra.mxu1 %v163_v44  ;;  %v1112_v22 = vand.u32 4294901760, %v37_v2  ;;  %v181_v44 = vand.u32 4294901760, %v180_v59  ;;  %v444_v59 = vand.u32 4294901760, %v443_v13  ;;  %v450_v13 = vand.u32 4294901760, %v449_v36  ;;  %v12_v36 = vld [vmem:[%s1401_s0] sm:$0xff] }
  0x25   :  { %235 = vmatpush.msra.mxu2 %v1015_v55  ;;  %433 = vmatpush.msrb.mxu3 %v432_v0  ;;  %v1426_v0 = vand.u32 4294901760, %v843_v19 }
  0x26   :  { %288 = vmatpush.msrb.mxu0 %v1424_v60  ;;  %170 = vmatpush.msra.mxu1 %v169_v34  ;;  %v1128_v60 = vand.u32 4294901760, %v36_v48  ;;  %v34_v34 = vld [vmem:[%s1402_s1 + $0xa0] sm:$0xff]  ;;  %v1141_v15 = vsub.f32 %v37_v2, %v1112_v22  ;;  %v461_v2 = vsub.f32 %v1096_v24, %v1427_v14 }
  0x27   :  { %388 = vmatpush.msrb.mxu2 %v966_v8  ;;  %439 = vmatpush.msrb.mxu3 %v438_v7  ;;  %v1158_v19 = vand.u32 4294901760, %v34_v34  ;;  %v1428_v7 = vand.u32 4294901760, %v846_v20 }
  0x28   :  { %292 = vmatpush.msrb.mxu0 %v1425_v6  ;;  %176 = vmatpush.msra.mxu1 %v175_v32  ;;  %v33_v32 = vld [vmem:[%s1402_s1 + $0x98] sm:$0xff]  ;;  %v1156_v45 = vsub.f32 %v36_v48, %v1128_v60  ;;  %v456_v48 = vand.u32 4294901760, %v455_v37  ;;  %v1172_v6 = vsub.f32 %v35_v62, %v1143_v16  ;;  %v32_v37 = vld [vmem:[%s1402_s1 + $0x90] sm:$0xff]  ;;  %v462_v62 = vand.u32 4294901760, %v461_v2 }
  0x29   :  { %390 = vmatpush.msrb.mxu2 %v981_v31  ;;  %445 = vmatpush.msrb.mxu3 %v444_v59  ;;  %v1174_v20 = vand.u32 4294901760, %v33_v32  ;;  %v1188_v14 = vsub.f32 %v34_v34, %v1158_v19  ;;  %v1203_v59 = vand.u32 4294901760, %v32_v37 }
  0x2a   :  { %296 = vmatpush.msrb.mxu0 %v1426_v0  ;;  %182 = vmatpush.msra.mxu1 %v181_v44  ;;  %v1429_v0 = vand.u32 4294901760, %v1102_v23 }
  0x2b   :  { %392 = vmatpush.msrb.mxu2 %v1010_v54  ;;  %451 = vmatpush.msrb.mxu3 %v450_v13  ;;  %v1433_v13 = vand.u32 4294901760, %v1141_v15 }
  0x2c   :  { %300 = vmatpush.msrb.mxu0 %v1428_v7  ;;  %351 = vmatpush.msrb.mxu1 %v799_v3  ;;  %v467_v44 = vsub.f32 %v1102_v23, %v1429_v0  ;;  %v1430_v3 = vand.u32 4294901760, %v849_v21  ;;  %v1431_v7 = vand.u32 4294901760, %v1118_v47  ;;  %v1190_v21 = vand.u32 4294901760, %v12_v36 }
  0x2d   :  { %394 = vmatpush.msrb.mxu2 %v1028_v12  ;;  %457 = vmatpush.msrb.mxu3 %v456_v48  ;;  %v479_v34 = vsub.f32 %v1141_v15, %v1433_v13  ;;  %v1435_v48 = vand.u32 4294901760, %v1156_v45  ;;  %v1438_v13 = vand.u32 4294901760, %v922_v52  ;;  %v1440_v52 = vand.u32 4294901760, %v927_v53 }
  0x2e   :  { %304 = vmatpush.msrb.mxu0 %v1430_v3  ;;  %353 = vmatpush.msrb.mxu1 %v801_v4  ;;  %v473_v0 = vsub.f32 %v1118_v47, %v1431_v7  ;;  %v1432_v4 = vand.u32 4294901760, %v866_v29  ;;  %v468_v3 = vand.u32 4294901760, %v467_v44  ;;  %v31_v7 = vld [vmem:[%s1402_s1 + $0x88] sm:$0xff]  ;;  %v1206_v29 = vsub.f32 %v33_v32, %v1174_v20 }
  0x2f   :  { %396 = vmatpush.msrb.mxu2 %v1044_v42  ;;  %463 = vmatpush.msrb.mxu3 %v462_v62  ;;  %v1217_v2 = vsub.f32 %v12_v36, %v1190_v21  ;;  %v1219_v32 = vand.u32 4294901760, %v31_v7  ;;  %v1437_v62 = vand.u32 4294901760, %v1172_v6 }
  0x30   :  { %308 = vmatpush.msrb.mxu0 %v1432_v4  ;;  %355 = vmatpush.msrb.mxu1 %v803_v5  ;;  %v1434_v5 = vand.u32 4294901760, %v893_v40  ;;  %v474_v44 = vand.u32 4294901760, %v473_v0  ;;  %v485_v4 = vsub.f32 %v1156_v45, %v1435_v48  ;;  %v30_v40 = vld [vmem:[%s1402_s1 + $0x80] sm:$0xff]  ;;  %v480_v0 = vand.u32 4294901760, %v479_v34 }
  0x31   :  { %398 = vmatpush.msrb.mxu2 %v1060_v51  ;;  %469 = vmatpush.msrb.mxu3 %v468_v3  ;;  %v491_v36 = vsub.f32 %v1172_v6, %v1437_v62  ;;  %v1233_v48 = vsub.f32 %v32_v37, %v1203_v59  ;;  %v1439_v3 = vand.u32 4294901760, %v1188_v14  ;;  %v1246_v37 = vsub.f32 %v31_v7, %v1219_v32 }
  0x32   :  { %312 = vmatpush.msrb.mxu0 %v1434_v5  ;;  %357 = vmatpush.msrb.mxu1 %v814_v9  ;;  %v1436_v9 = vand.u32 4294901760, %v907_v46  ;;  %v502_v5 = vand.u32 4294901760, %v1206_v29  ;;  %v1238_v46 = vand.u32 4294901760, %v30_v40 }
  0x33   :  { %400 = vmatpush.msrb.mxu2 %v1070_v61  ;;  %475 = vmatpush.msrb.mxu3 %v474_v44  ;;  %v497_v34 = vsub.f32 %v1188_v14, %v1439_v3  ;;  %v492_v44 = vand.u32 4294901760, %v491_v36  ;;  %v508_v7 = vand.u32 4294901760, %v1233_v48  ;;  %v514_v62 = vand.u32 4294901760, %v1246_v37 }
  0x34   :  { %316 = vmatpush.msrb.mxu0 %v1436_v9  ;;  %359 = vmatpush.msrb.mxu1 %v816_v10  ;;  %v486_v10 = vand.u32 4294901760, %v485_v4  ;;  %v80_v9 = vand.u32 4294901760, %v1217_v2  ;;  %v503_v4 = vsub.f32 %v1206_v29, %v502_v5  ;;  %v1442_v3 = vand.u32 4294901760, %v975_v26 }
  0x35   :  { %402 = vmatpush.msrb.mxu2 %v1085_v27  ;;  %481 = vmatpush.msrb.mxu3 %v480_v0  ;;  %v498_v53 = vand.u32 4294901760, %v497_v34 }
  0x36   :  { %320 = vmatpush.msrb.mxu0 %v1438_v13  ;;  %361 = vmatpush.msrb.mxu1 %v818_v11  ;;  %v13_v11 = vld [vmem:[%s1401_s0 + $0x8] sm:$0xff]  ;;  %v1441_v13 = vand.u32 4294901760, %v955_v1  ;;  %v81_v0 = vsub.f32 %v1217_v2, %v80_v9  ;;  %v509_v1 = vsub.f32 %v1233_v48, %v508_v7  ;;  %s774_s0 = smov [#allocation2]  }
  0x37   :  { %404 = vmatpush.msrb.mxu2 %v1112_v22  ;;  %487 = vmatpush.msrb.mxu3 %v486_v10  ;;  %v1268_v36 = vand.u32 4294901760, %v13_v11  ;;  %s736_s20 = sshll.u32 %s774_s0, 4  ;;  %s737_s20 = int_to_ptr.vmem [resolvable:$true] %s736_s20 }
  0x38   :  { %324 = vmatpush.msrb.mxu0 %v1440_v52  ;;  %363 = vmatpush.msrb.mxu1 %v837_v17  ;;  %v1263_v17 = vsub.f32 %v30_v40, %v1238_v46  ;;  %v1443_v40 = vand.u32 4294901760, %v992_v39  ;;  %v82_v26 = vand.u32 4294901760, %v81_v0  ;;  %v1444_v52 = vand.u32 4294901760, %v1008_v49 }
  0x39   :  { %406 = vmatpush.msrb.mxu2 %v1128_v60  ;;  %493 = vmatpush.msrb.mxu3 %v492_v44  ;;  %v1286_v34 = vsub.f32 %v13_v11, %v1268_v36  ;;  %v1445_v39 = vand.u32 4294901760, %v1015_v55 }
  0x3a   :  { %328 = vmatpush.msrb.mxu0 %v1441_v13  ;;  %365 = vmatpush.msrb.mxu1 %v856_v25  ;;  %v504_v25 = vand.u32 4294901760, %v503_v4  ;;  %v520_v10 = vand.u32 4294901760, %v1263_v17 }
  0x3b   :  { %408 = vmatpush.msrb.mxu2 %v1143_v16  ;;  %499 = vmatpush.msrb.mxu3 %v498_v53  ;;  %v421_v11 = vand.u32 4294901760, %v1286_v34 }
  0x3c   :  { %332 = vmatpush.msrb.mxu0 %v1442_v3  ;;  %367 = vmatpush.msrb.mxu1 %v863_v28  ;;  %v515_v28 = vsub.f32 %v1246_v37, %v514_v62  ;;  %v521_v44 = vsub.f32 %v1263_v17, %v520_v10 }
  0x3d   :  { %410 = vmatpush.msrb.mxu2 %v1158_v19  ;;  %505 = vmatpush.msrb.mxu3 %v504_v25 }
  0x3e   :  { %336 = vmatpush.msrb.mxu0 %v1443_v40  ;;  %369 = vmatpush.msrb.mxu1 %v884_v35  ;;  %v510_v35 = vand.u32 4294901760, %v509_v1  ;;  %v516_v49 = vand.u32 4294901760, %v515_v28 }
  0x3f   :  { %412 = vmatpush.msrb.mxu2 %v1174_v20  ;;  %83 = vmatmul.f32.vlgmr.msra.gmra.mxu0 %v82_v26 }
  0x40   :  { %340 = vmatpush.msrb.mxu0 %v1444_v52  ;;  %371 = vmatpush.msrb.mxu1 %v896_v41  ;;  %v522_v41 = vand.u32 4294901760, %v521_v44 }
  0x41   :  { %414 = vmatpush.msrb.mxu2 %v1203_v59  ;;  %511 = vmatpush.msrb.mxu3 %v510_v35 }
  0x42   :  { %344 = vmatpush.msrb.mxu0 %v1445_v39  ;;  %373 = vmatpush.msrb.mxu1 %v918_v50  ;;  %v422_v50 = vsub.f32 %v1286_v34, %v421_v11 }
  0x43   :  { %416 = vmatpush.msrb.mxu2 %v1219_v32  ;;  %517 = vmatpush.msrb.mxu3 %v516_v49 }
  0x44   :  { %531 = vmatpush.msra.mxu0 %v1000_v43  ;;  %375 = vmatpush.msrb.mxu1 %v936_v57  ;;  %v1446_v57 = vand.u32 4294901760, %v1000_v43  ;;  %v423_v55 = vand.u32 4294901760, %v422_v50  ;;  %v1448_v43 = vand.u32 4294901760, %v1042_v38 }
  0x45   :  { %238 = vmatmul.f32.vlgmr.msra.gmra.mxu2 %v1217_v2  ;;  %277 = vmatmul.f32.vlgmr.msra.gmra.mxu3 %v80_v9 }
  0x46   :  { %534 = vmatpush.msra.mxu0 %v1018_v56  ;;  %377 = vmatpush.msrb.mxu1 %v951_v63  ;;  %v1447_v63 = vand.u32 4294901760, %v1018_v56 }
  0x47   :  { %418 = vmatpush.msrb.mxu2 %v1238_v46  ;;  %523 = vmatpush.msrb.mxu3 %v522_v41 }
  0x48   :  { %537 = vmatpush.msra.mxu0 %v1042_v38  ;;  %379 = vmatpush.msrb.mxu1 %v972_v18  ;;  %v1449_v18 = vand.u32 4294901760, %v1058_v58 }
  0x49   :  { %625 = vmatpush.msra.mxu2 %v1446_v57  ;;  %184 = vmatmul.f32.vlgmr.msra.gmra.mxu1 %v1190_v21 }
  0x4a   :  { %540 = vmatpush.msra.mxu0 %v1058_v58  ;;  %692 = vmatpush.msra.mxu3 %v966_v8  ;;  %v1451_v58 = vand.u32 4294901760, %v1096_v24 }
  0x4b   :  { %629 = vmatpush.msra.mxu2 %v1447_v63  ;;  %381 = vmatpush.msrb.mxu1 %v979_v30  ;;  %v1453_v30 = vand.u32 4294901760, %v1118_v47 }
  0x4c   :  { %543 = vmatpush.msra.mxu0 %v1078_v33  ;;  %694 = vmatpush.msra.mxu3 %v981_v31 }
  0x4d   :  { %584 = vmatpush.msra.mxu1 %v966_v8  ;;  %633 = vmatpush.msra.mxu2 %v1448_v43  ;;  %v1450_v8 = vand.u32 4294901760, %v1078_v33  ;;  %v1452_v33 = vand.u32 4294901760, %v1102_v23 }
  0x4e   :  { %424 = vmatmul.f32.vlgmr.msrb.gmra.mxu2 %v423_v55  ;;  %546 = vmatpush.msra.mxu0 %v1096_v24  ;;  %v1454_v24 = vand.u32 4294901760, %v1141_v15 }
  0x4f   :  { %586 = vmatpush.msra.mxu1 %v981_v31  ;;  %637 = vmatpush.msra.mxu2 %v1449_v18 }
  0x50   :  { %696 = vmatpush.msra.mxu3 %v1010_v54  ;;  %346 = vmatmul.f32.vlgmr.msrb.gmra.mxu0 %v1190_v21 }
  0x51   :  { %525 = vmatmul.f32.vlgmr.msrb.gmra.mxu3 %v1268_v36  ;;  %549 = vmatpush.msra.mxu0 %v1102_v23  ;;  %v1455_v23 = vand.u32 4294901760, %v1156_v45 }
  0x52   :  { %588 = vmatpush.msra.mxu1 %v1010_v54  ;;  %641 = vmatpush.msra.mxu2 %v1450_v8 }
  0x53   :  { %698 = vmatpush.msra.mxu3 %v1028_v12  ;;  %383 = vmatmul.f32.vlgmr.msrb.gmra.mxu1 %v1190_v21 }
  0x54   :  { %552 = vmatpush.msra.mxu0 %v1118_v47  ;;  %590 = vmatpush.msra.mxu1 %v1028_v12 }
  0x55   :  { %645 = vmatpush.msra.mxu2 %v1451_v58  ;;  %700 = vmatpush.msra.mxu3 %v1044_v42 }
  0x56   :  { %555 = vmatpush.msra.mxu0 %v1141_v15  ;;  %592 = vmatpush.msra.mxu1 %v1044_v42 }
  0x57   :  { %649 = vmatpush.msra.mxu2 %v1452_v33  ;;  %702 = vmatpush.msra.mxu3 %v1060_v51 }
  0x58   :  { %558 = vmatpush.msra.mxu0 %v1156_v45  ;;  %594 = vmatpush.msra.mxu1 %v1060_v51  ;;  %v1456_v51 = vand.u32 4294901760, %v1172_v6 }
  0x59   :  { %653 = vmatpush.msra.mxu2 %v1453_v30  ;;  %704 = vmatpush.msra.mxu3 %v1070_v61 }
  0x5a   :  { %561 = vmatpush.msra.mxu0 %v1172_v6  ;;  %596 = vmatpush.msra.mxu1 %v1070_v61 }
  0x5b   :  { %657 = vmatpush.msra.mxu2 %v1454_v24  ;;  %706 = vmatpush.msra.mxu3 %v1085_v27 }
  0x5c   :  { %564 = vmatpush.msra.mxu0 %v1188_v14  ;;  %598 = vmatpush.msra.mxu1 %v1085_v27  ;;  %v1457_v27 = vand.u32 4294901760, %v1188_v14 }
  0x5d   :  { %661 = vmatpush.msra.mxu2 %v1455_v23  ;;  %708 = vmatpush.msra.mxu3 %v1112_v22 }
  0x5e   :  { %567 = vmatpush.msra.mxu0 %v1206_v29  ;;  %600 = vmatpush.msra.mxu1 %v1112_v22 }
  0x5f   :  { %665 = vmatpush.msra.mxu2 %v1456_v51  ;;  %710 = vmatpush.msra.mxu3 %v1128_v60 }
  0x60   :  { %570 = vmatpush.msra.mxu0 %v1233_v48  ;;  %602 = vmatpush.msra.mxu1 %v1128_v60 }
  0x61   :  { %669 = vmatpush.msra.mxu2 %v1457_v27  ;;  %712 = vmatpush.msra.mxu3 %v1143_v16 }
  0x62   :  { %573 = vmatpush.msra.mxu0 %v1246_v37  ;;  %604 = vmatpush.msra.mxu1 %v1143_v16 }
  0x63   :  { %673 = vmatpush.msra.mxu2 %v502_v5  ;;  %714 = vmatpush.msra.mxu3 %v1158_v19 }
  0x64   :  { %576 = vmatpush.msra.mxu0 %v1263_v17  ;;  %606 = vmatpush.msra.mxu1 %v1158_v19 }
  0x65   :  { %677 = vmatpush.msra.mxu2 %v508_v7  ;;  %716 = vmatpush.msra.mxu3 %v1174_v20 }
  0x66   :  { %579 = vmatmul.f32.vlgmr.msra.gmra.mxu0 %v1286_v34  ;;  %608 = vmatpush.msra.mxu1 %v1174_v20 }
  0x67   :  { %681 = vmatpush.msra.mxu2 %v514_v62  ;;  %718 = vmatpush.msra.mxu3 %v1203_v59 }
  0x68   :  { %610 = vmatpush.msra.mxu1 %v1203_v59 }
  0x69   :  { %685 = vmatpush.msra.mxu2 %v520_v10  ;;  %720 = vmatpush.msra.mxu3 %v1219_v32 }
  0x6a   :  { %687 = vmatmul.f32.vlgmr.msra.gmra.mxu2 %v1268_v36  ;;  %612 = vmatpush.msra.mxu1 %v1219_v32 }
  0x6b   :  { %722 = vmatpush.msra.mxu3 %v1238_v46 }
  0x6c   :  { %724 = vmatmul.f32.vlgmr.msra.gmra.mxu3 %v1268_v36  ;;  %614 = vmatpush.msra.mxu1 %v1238_v46 }
  0x6d   :  { %618 = vmatmul.f32.vlgmr.msra.gmra.mxu1 %v421_v11 }
  0xbc   :  { %v84_v38 = vpop.f32.mrf.mxu0 }
  0xc6   :  { %v185_v31 = vpop.f32.mrf.mxu1 }
  0xc7   :  { %v186_v54 = vadd.f32 %v185_v31, %v84_v38 }
  0xc8   :  { %v239_v56 = vpop.f32.mrf.mxu2  ;;  %v278_v42 = vpop.f32.mrf.mxu3 }
  0xc9   :  { %v240_v12 = vadd.f32 %v239_v56, %v186_v54 }
  0xcb   :  { %v279_v47 = vadd.f32 %v278_v42, %v240_v12 }
  0xcd   :  { %v347_v61 = vpop.f32.mrf.mxu0 }
  0xce   :  { %v348_v22 = vadd.f32 %v347_v61, %v279_v47 }
  0xd0   :  { %v384_v15 = vpop.f32.mrf.mxu1 }
  0xd1   :  { %v385_v60 = vadd.f32 %v384_v15, %v348_v22  ;;  %v425_v45 = vpop.f32.mrf.mxu2 }
  0xd3   :  { %v426_v16 = vadd.f32 %v425_v45, %v385_v60 }
  0xd4   :  { %v526_v6 = vpop.f32.mrf.mxu3 }
  0xd5   :  { %v527_v14 = vadd.f32 %v526_v6, %v426_v16 }
  0xe3   :  { %v580_v19 = vpop.f32.mrf.mxu0 }
  0xe4   :  { %v581_v20 = vadd.f32 %v580_v19, %v527_v14 }
  0xea   :  { %v619_v59 = vpop.f32.mrf.mxu1 }
  0xeb   :  { %v620_v21 = vadd.f32 %v619_v59, %v581_v20 }
  0xed   :  { %v688_v2 = vpop.f32.mrf.mxu2 }
  0xee   :  { %v689_v29 = vadd.f32 %v688_v2, %v620_v21 }
  0xef   :  { %v725_v32 = vpop.f32.mrf.mxu3 }
  0xf0   :  { %v726_v5 = vadd.f32 %v725_v32, %v689_v29 }
  0xf2   :  { %v728_v48 = vmul.f32 0.0625, %v726_v5 }
  0xf4   :  { %730 = vst.msk [vmem:[#allocation2] sm:$0xff] %vm729_vm0, %v728_v48 }
  0xf5   :  { %741 = dma.vmem_to_hbm [thread:$0]  %s737_s20, 128, %s739_s23, [#allocation3]  }
  0xf6   :  { %772 = dma.done.wait [#allocation3], 128  }
  0xf7   :  { %773 = vsyncadd [#allocation3], 4294967168 }
  0xf8   :  { %746 = vsyncpa [#allocation3], 1 }

// kernel: tpu_custom_call.1
= control target key start
LH: loop header
LB: loop body
LE: loop exit
PB: predicated region body
PF: predicated region fallthrough
CT: control target
= control target key end

     0   :  { %s253_s0 = inlined_call_operand.vmem [shape: f32[8,256], index: 0, kind: input, shape index: {}]   ;;  %s254_s1 = inlined_call_operand.vmem [shape: f32[256,16], index: 1, kind: input, shape index: {}]   ;;  %s255_s2 = inlined_call_operand.hbm [shape: f32[8,16], index: 2, kind: output, shape index: {}]  }
   0x1   :  { %v29_v0 = vld [vmem:[%s254_s1 + $0x78] sm:$0xff]  ;;  %v28_v2 = vld [vmem:[%s254_s1 + $0x70] sm:$0xff]  ;;  %v27_v4 = vld [vmem:[%s254_s1 + $0x68] sm:$0xff] }
   0x2   :  { %v45_v1 = vld [vmem:[%s254_s1 + $0xf8] sm:$0xff]  ;;  %46 = vmatpush.msra.mxu0 %v29_v0  ;;  %v44_v3 = vld [vmem:[%s254_s1 + $0xf0] sm:$0xff]  ;;  %v43_v5 = vld [vmem:[%s254_s1 + $0xe8] sm:$0xff] }
   0x3   :  { %66 = vmatpush.msra.mxu1 %v45_v1  ;;  %v26_v6 = vld [vmem:[%s254_s1 + $0x60] sm:$0xff]  ;;  %v25_v8 = vld [vmem:[%s254_s1 + $0x58] sm:$0xff]  ;;  %v24_v10 = vld [vmem:[%s254_s1 + $0x50] sm:$0xff] }
   0x4   :  { %47 = vmatpush.msra.mxu0 %v28_v2  ;;  %v42_v7 = vld [vmem:[%s254_s1 + $0xe0] sm:$0xff]  ;;  %v41_v9 = vld [vmem:[%s254_s1 + $0xd8] sm:$0xff]  ;;  %v40_v11 = vld [vmem:[%s254_s1 + $0xd0] sm:$0xff] }
   0x5   :  { %67 = vmatpush.msra.mxu1 %v44_v3  ;;  %v23_v12 = vld [vmem:[%s254_s1 + $0x48] sm:$0xff] }
   0x6   :  { %48 = vmatpush.msra.mxu0 %v27_v4  ;;  %v39_v13 = vld [vmem:[%s254_s1 + $0xc8] sm:$0xff] }
   0x7   :  { %68 = vmatpush.msra.mxu1 %v43_v5 }
   0x8   :  { %49 = vmatpush.msra.mxu0 %v26_v6 }
   0x9   :  { %69 = vmatpush.msra.mxu1 %v42_v7 }
   0xa   :  { %50 = vmatpush.msra.mxu0 %v25_v8 }
   0xb   :  { %70 = vmatpush.msra.mxu1 %v41_v9 }
   0xc   :  { %51 = vmatpush.msra.mxu0 %v24_v10 }
   0xd   :  { %71 = vmatpush.msra.mxu1 %v40_v11 }
   0xe   :  { %7 = vsyncpa [#allocation3], 0  ;;  %v22_v14 = vld [vmem:[%s254_s1 + $0x40] sm:$0xff]  ;;  %52 = vmatpush.msra.mxu0 %v23_v12  ;;  %v21_v16 = vld [vmem:[%s254_s1 + $0x38] sm:$0xff]  ;;  %s132_s21 = smov [#allocation2]   ;;  %s96_s24 = sshll.u32 %s255_s2, 4  ;;  %s97_s24 = int_to_ptr.hbm [resolvable:$true] %s96_s24 }
   0xf   :  { %v38_v15 = vld [vmem:[%s254_s1 + $0xc0] sm:$0xff]  ;;  %72 = vmatpush.msra.mxu1 %v39_v13  ;;  %v37_v17 = vld [vmem:[%s254_s1 + $0xb8] sm:$0xff]  ;;  %v20_v18 = vld [vmem:[%s254_s1 + $0x30] sm:$0xff]  ;;  %s94_s22 = sshll.u32 %s132_s21, 4  ;;  %vm87_vm0 = vcmask 130048   ;;  %s95_s22 = int_to_ptr.vmem [resolvable:$true] %s94_s22 }
  0x10   :  { %53 = vmatpush.msra.mxu0 %v22_v14  ;;  %v36_v19 = vld [vmem:[%s254_s1 + $0xb0] sm:$0xff]  ;;  %v19_v20 = vld [vmem:[%s254_s1 + $0x28] sm:$0xff]  ;;  %v18_v22 = vld [vmem:[%s254_s1 + $0x20] sm:$0xff] }
  0x11   :  { %73 = vmatpush.msra.mxu1 %v38_v15  ;;  %v35_v21 = vld [vmem:[%s254_s1 + $0xa8] sm:$0xff]  ;;  %v34_v23 = vld [vmem:[%s254_s1 + $0xa0] sm:$0xff]  ;;  %v17_v24 = vld [vmem:[%s254_s1 + $0x18] sm:$0xff] }
  0x12   :  { %54 = vmatpush.msra.mxu0 %v21_v16  ;;  %v33_v25 = vld [vmem:[%s254_s1 + $0x98] sm:$0xff]  ;;  %v16_v26 = vld [vmem:[%s254_s1 + $0x10] sm:$0xff]  ;;  %v15_v28 = vld [vmem:[%s254_s1 + $0x8] sm:$0xff] }
  0x13   :  { %74 = vmatpush.msra.mxu1 %v37_v17  ;;  %v32_v27 = vld [vmem:[%s254_s1 + $0x90] sm:$0xff]  ;;  %v31_v29 = vld [vmem:[%s254_s1 + $0x88] sm:$0xff]  ;;  %v14_v30 = vld [vmem:[%s254_s1] sm:$0xff] }
  0x14   :  { %55 = vmatpush.msra.mxu0 %v20_v18  ;;  %v30_v31 = vld [vmem:[%s254_s1 + $0x80] sm:$0xff]  ;;  %v13_v33 = vld [vmem:[%s253_s0 + $0x8] sm:$0xff] }
  0x15   :  { %75 = vmatpush.msra.mxu1 %v36_v19  ;;  %v12_v32 = vld [vmem:[%s253_s0] sm:$0xff] }
  0x16   :  { %56 = vmatpush.msra.mxu0 %v19_v20 }
  0x17   :  { %76 = vmatpush.msra.mxu1 %v35_v21 }
  0x18   :  { %57 = vmatpush.msra.mxu0 %v18_v22 }
  0x19   :  { %77 = vmatpush.msra.mxu1 %v34_v23 }
  0x1a   :  { %58 = vmatpush.msra.mxu0 %v17_v24 }
  0x1b   :  { %78 = vmatpush.msra.mxu1 %v33_v25 }
  0x1c   :  { %59 = vmatpush.msra.mxu0 %v16_v26 }
  0x1d   :  { %79 = vmatpush.msra.mxu1 %v32_v27 }
  0x1e   :  { %60 = vmatpush.msra.mxu0 %v15_v28 }
  0x1f   :  { %80 = vmatpush.msra.mxu1 %v31_v29 }
  0x20   :  { %61 = vmatpush.msra.mxu0 %v14_v30 }
  0x21   :  { %81 = vmatpush.msra.mxu1 %v30_v31  ;;  %62 = vmatmul.f32.vlgmr.msra.gmra.mxu0 %v12_v32 }
  0x22   :  { %82 = vmatmul.f32.vlgmr.msra.gmra.mxu1 %v13_v33 }
  0x9e   :  { %v63_v34 = vpop.f32.mrf.mxu0 }
  0x9f   :  { %v83_v35 = vpop.f32.mrf.mxu1 }
  0xa0   :  { %v84_v36 = vadd.f32 %v83_v35, %v63_v34 }
  0xa2   :  { %v86_v37 = vmul.f32 0.0625, %v84_v36 }
  0xa4   :  { %88 = vst.msk [vmem:[#allocation2] sm:$0xff] %vm87_vm0, %v86_v37 }
  0xa5   :  { %99 = dma.vmem_to_hbm [thread:$0]  %s95_s22, 128, %s97_s24, [#allocation3]  }
  0xa6   :  { %130 = dma.done.wait [#allocation3], 128  }
  0xa7   :  { %131 = vsyncadd [#allocation3], 4294967168 }
  0xa8   :  { %104 = vsyncpa [#allocation3], 1 }

</bundles_post_ra>
